<compile_context>
chip_gen: v7x
topology: tpu7x:2x2x1
jax: 0.10.0
libtpu: 0.0.40
codegen_flags: <defaults>
</compile_context>

<pallas_src>
import math

import jax
import jax.numpy as jnp
from jax import lax
from jax.experimental import pallas as pl
from jax.experimental.pallas import tpu as pltpu

# ----------------------------- config -----------------------------
D_MODEL = 128
N_HEADS = 4
D_HEAD = 32
D_MLP = 256
SEQ = 8
BATCH = 2
EPS = 1e-5
ATTN_SCALE = math.sqrt(D_HEAD)
IGNORE = -100000.0                # matches the module's IGNORE buffer
HDH = N_HEADS * D_HEAD            # 128


def _gelu_new(x):
    # gelu_new (tanh approximation), as used by EasyTransformer for act_fn='gelu_new'
    return 0.5 * x * (
        1.0 + jnp.tanh(math.sqrt(2.0 / math.pi) * (x + 0.044715 * x * x * x))
    )


def _layernorm(v, w, b):
    # v: [R, L] f32, w/b: [1, L] f32.  rsqrt keeps the normalisation on the EUP.
    v = v - jnp.mean(v, axis=-1, keepdims=True)
    inv = lax.rsqrt(jnp.mean(v * v, axis=-1, keepdims=True) + EPS)
    return (v * inv) * w + b


# ----------------------------- kernel -----------------------------
def transformer_block_kernel(
    x_ref,                   # [S, D]      f32  resid_pre rows of one batch element
    mask_ref,                # [S, S]      f32  additive causal bias (0 / IGNORE)
    ln1w_ref, ln1b_ref,      # [1, D]      f32
    wqkv_ref,                # [D, 3*H*Dh] bf16 (Q block pre-scaled by 1/sqrt(Dh))
    bqkv_ref,                # [1, 3*H*Dh] f32  (Q part pre-scaled)
    wo_ref,                  # [H*Dh, D]   bf16 (row block h -> W_O[h].T)
    bo_ref,                  # [1, D]      f32
    ln2w_ref, ln2b_ref,      # [1, D]      f32
    win_ref,                 # [D, M]      bf16
    bin_ref,                 # [1, M]      f32
    wout_ref,                # [M, D]      bf16
    bout_ref,                # [1, D]      f32
    o_ref,                   # [S, D]      f32  resid_post rows of this batch element
):
    x = x_ref[...]                                               # [S, D] f32

    # --- LN1 (f32 VPU/EUP math) ---
    n1 = _layernorm(x, ln1w_ref[...], ln1b_ref[...])

    # --- fused Q/K/V projection: one lane-dense [S,128] x [128,384] bf16 matmul ---
    qkv = jnp.dot(n1.astype(jnp.bfloat16), wqkv_ref[...],
                  preferred_element_type=jnp.float32) + bqkv_ref[...]

    q = qkv[:, :HDH].astype(jnp.bfloat16)                        # [S, H*Dh]
    # One transpose of the K slab (instead of a transposed-RHS contraction per head)
    k_t = jnp.transpose(qkv[:, HDH:2 * HDH]).astype(jnp.bfloat16)  # [H*Dh, S]
    v = qkv[:, 2 * HDH:].astype(jnp.bfloat16)                    # [S, H*Dh]

    mask_bias = mask_ref[...]                                    # [S, S] f32

    # --- per-head scores / softmax / PV, accumulated straight into a lane-dense
    #     [S, D_MODEL] f32 attention output (no lane concat, no narrow z slab) ---
    attn_out = jnp.zeros((x.shape[0], D_MODEL), jnp.float32)
    for h in range(N_HEADS):
        lo, hi = h * D_HEAD, (h + 1) * D_HEAD
        s = jnp.dot(q[:, lo:hi], k_t[lo:hi, :],
                    preferred_element_type=jnp.float32)          # [S, S]
        # Additive causal mask; numerically equivalent to the module's
        # torch.where(mask, scores, IGNORE) after the max-subtraction below.
        s = s + mask_bias
        s = s - jnp.max(s, axis=-1, keepdims=True)
        p = jnp.exp(s)
        p = p * pl.reciprocal(jnp.sum(p, axis=-1, keepdims=True), approx=True)
        z_h = jnp.dot(p.astype(jnp.bfloat16), v[:, lo:hi],
                      preferred_element_type=jnp.float32)        # [S, Dh]
        attn_out = attn_out + jnp.dot(
            z_h.astype(jnp.bfloat16), wo_ref[lo:hi, :],
            preferred_element_type=jnp.float32)                  # [S, D]

    attn_out = attn_out + bo_ref[...]
    resid_mid = x + attn_out

    # --- LN2 + MLP ---
    n2 = _layernorm(resid_mid, ln2w_ref[...], ln2b_ref[...])
    pre = jnp.dot(n2.astype(jnp.bfloat16), win_ref[...],
                  preferred_element_type=jnp.float32) + bin_ref[...]
    post = _gelu_new(pre)
    mlp_out = jnp.dot(post.astype(jnp.bfloat16), wout_ref[...],
                      preferred_element_type=jnp.float32) + bout_ref[...]

    o_ref[...] = (resid_mid + mlp_out).astype(o_ref.dtype)


# ----------------------------- wrapper -----------------------------
def transformer_block(x, mask_bias, kparams):
    B, S, D = x.shape
    bs = B * S
    xf = x.reshape(bs, D)                    # lane-dense [B*S, 128] activation slab
    args = (xf, mask_bias) + tuple(kparams)

    matmul_flops = 2 * bs * (D * 3 * HDH + HDH * D + D * D_MLP + D_MLP * D)
    attn_flops = 2 * N_HEADS * bs * S * D_HEAD * 2
    cost = pl.CostEstimate(
        flops=int(matmul_flops + attn_flops),
        transcendentals=int(N_HEADS * bs * S + bs * D_MLP),
        bytes_accessed=int(sum(int(a.size) * a.dtype.itemsize for a in args)
                           + bs * D * 4),
    )

    # Weights / biases / mask use a constant index_map: same block every grid
    # step, so they stay resident in VMEM (no re-DMA across batch iterations).
    const = lambda a: pl.BlockSpec(a.shape, lambda b: (0, 0))
    in_specs = [
        pl.BlockSpec((S, D), lambda b: (b, 0)),      # x rows of batch element b
        const(mask_bias),
    ] + [const(a) for a in kparams]

    grid_spec = pltpu.PrefetchScalarGridSpec(
        num_scalar_prefetch=0,
        grid=(B,),
        in_specs=in_specs,
        out_specs=pl.BlockSpec((S, D), lambda b: (b, 0)),
    )

    out = pl.pallas_call(
        transformer_block_kernel,
        out_shape=jax.ShapeDtypeStruct((bs, D), x.dtype),
        grid_spec=grid_spec,
        compiler_params=pltpu.CompilerParams(dimension_semantics=("parallel",)),
        cost_estimate=cost,
    )(*args)
    return out.reshape(B, S, D)


# ----------------------------- parameter / mask prep -----------------------------
def make_causal_bias(seq):
    # Precomputed host-side so the kernel does not rebuild it every call.
    mask = jnp.tril(jnp.ones((seq, seq), dtype=bool))
    return jnp.where(mask, 0.0, IGNORE).astype(jnp.float32)


def prepare_kernel_params(natural):
    """Re-layout the module's natural (PyTorch-shaped) parameters into fused,
    lane-dense, MXU-friendly kernel parameters (bf16 weights, f32 biases)."""
    (W_Q, b_Q, W_K, b_K, W_V, b_V, W_O, b_O,
     ln1w, ln1b, ln2w, ln2b, W_in, b_in, W_out, b_out) = natural

    def heads_to_cols(W):            # [H, Dh, D] -> [D, H*Dh]
        return jnp.transpose(W, (2, 0, 1)).reshape(D_MODEL, HDH)

    wq = heads_to_cols(W_Q) / ATTN_SCALE        # fold attention scale into Q
    wk = heads_to_cols(W_K)
    wv = heads_to_cols(W_V)
    wqkv = jnp.concatenate([wq, wk, wv], axis=1).astype(jnp.bfloat16)      # [D, 384]

    bq = (b_Q / ATTN_SCALE).reshape(1, HDH)
    bqkv = jnp.concatenate([bq, b_K.reshape(1, HDH), b_V.reshape(1, HDH)],
                           axis=1).astype(jnp.float32)                     # [1, 384]

    # Rows h*Dh:(h+1)*Dh of wo are W_O[h].T -> sublane-sliceable per head.
    wo = jnp.transpose(W_O, (0, 2, 1)).reshape(HDH, D_MODEL).astype(jnp.bfloat16)
    bo = b_O.reshape(1, D_MODEL).astype(jnp.float32)

    win = W_in.T.astype(jnp.bfloat16)           # [D, M]
    b_in2 = b_in.reshape(1, D_MLP).astype(jnp.float32)
    wout = W_out.T.astype(jnp.bfloat16)         # [M, D]
    b_out2 = b_out.reshape(1, D_MODEL).astype(jnp.float32)

    row = lambda a: a.reshape(1, -1).astype(jnp.float32)
    return (row(ln1w), row(ln1b), wqkv, bqkv, wo, bo,
            row(ln2w), row(ln2b), win, b_in2, wout, b_out2)


# ----------------------------- reference (pure JAX, f32, module layout) --------
def reference_block(x, natural):
    (W_Q, b_Q, W_K, b_K, W_V, b_V, W_O, b_O,
     ln1w, ln1b, ln2w, ln2b, W_in, b_in, W_out, b_out) = natural

    def ln(v, w, b):
        v = v - v.mean(-1, keepdims=True)
        s = jnp.sqrt((v * v).mean(-1, keepdims=True) + EPS)
        return v / s * w + b

    n1 = ln(x, ln1w, ln1b)
    q = jnp.einsum('ihm,bpm->bpih', W_Q, n1) + b_Q
    k = jnp.einsum('ihm,bpm->bpih', W_K, n1) + b_K
    v = jnp.einsum('ihm,bpm->bpih', W_V, n1) + b_V
    scores = jnp.einsum('bpih,bqih->bipq', q, k) / ATTN_SCALE
    S = x.shape[1]
    mask = jnp.tril(jnp.ones((S, S), bool))
    scores = jnp.where(mask[None, None], scores, IGNORE)
    attn = jax.nn.softmax(scores, axis=-1)
    z = jnp.einsum('bpih,biqp->bqih', v, attn)
    attn_out = jnp.einsum('idh,bqih->bqd', W_O, z) + b_O
    resid_mid = x + attn_out
    n2 = ln(resid_mid, ln2w, ln2b)
    pre = jnp.einsum('md,bpd->bpm', W_in, n2) + b_in
    post = _gelu_new(pre)
    mlp_out = jnp.einsum('dm,bpm->bpd', W_out, post) + b_out
    return resid_mid + mlp_out


# ----------------------------- main -----------------------------
if __name__ == "__main__":
    key = jax.random.PRNGKey(0)
    keys = jax.random.split(key, 16)

    def init_w(k, shape, scale=0.1):
        # matmul weights are stored at bf16 precision (what the kernel keeps in VMEM);
        # the f32 reference uses the same (bf16-representable) values.
        w = (scale * jax.random.normal(k, shape)).astype(jnp.float32)
        return w.astype(jnp.bfloat16).astype(jnp.float32)

    def init_b(k, shape, scale=0.1):
        return (scale * jax.random.normal(k, shape)).astype(jnp.float32)

    # Natural (PyTorch-layout) parameters of the module.
    W_Q = init_w(keys[0], (N_HEADS, D_HEAD, D_MODEL))
    W_K = init_w(keys[1], (N_HEADS, D_HEAD, D_MODEL))
    W_V = init_w(keys[2], (N_HEADS, D_HEAD, D_MODEL))
    W_O = init_w(keys[3], (N_HEADS, D_MODEL, D_HEAD))
    b_Q = init_b(keys[4], (N_HEADS, D_HEAD))
    b_K = init_b(keys[5], (N_HEADS, D_HEAD))
    b_V = init_b(keys[6], (N_HEADS, D_HEAD))
    b_O = init_b(keys[7], (D_MODEL,))
    W_in = init_w(keys[8], (D_MLP, D_MODEL))
    b_in = init_b(keys[9], (D_MLP,))
    W_out = init_w(keys[10], (D_MODEL, D_MLP))
    b_out = init_b(keys[11], (D_MODEL,))
    ln1w = jnp.ones((D_MODEL,), jnp.float32)
    ln1b = jnp.zeros((D_MODEL,), jnp.float32)
    ln2w = jnp.ones((D_MODEL,), jnp.float32)
    ln2b = jnp.zeros((D_MODEL,), jnp.float32)

    natural = (W_Q, b_Q, W_K, b_K, W_V, b_V, W_O, b_O,
               ln1w, ln1b, ln2w, ln2b, W_in, b_in, W_out, b_out)
    kparams = prepare_kernel_params(natural)
    mask_bias = make_causal_bias(SEQ)

    x = jax.random.normal(keys[12], (BATCH, SEQ, D_MODEL), jnp.float32)

    out = jax.block_until_ready(transformer_block(x, mask_bias, kparams))
    ref = jax.block_until_ready(reference_block(x, natural))

    assert out.shape == (BATCH, SEQ, D_MODEL)
    err = jnp.max(jnp.abs(out - ref))
    # bf16 MXU inputs + approx reciprocal => relaxed tolerance vs the f32 reference.
    assert jnp.allclose(out, ref, atol=2e-2, rtol=2e-2), f"max abs err {err}"

    print("KERNEL_OK")
</pallas_src>

<mosaic_0001>
module attributes {stable_mosaic.version = 11 : i64} {
  func.func @transformer_block_kernel(%arg0: i32, %arg1: memref<8x128xf32, #tpu.memory_space<vmem>>, %arg2: memref<8x8xf32, #tpu.memory_space<vmem>>, %arg3: memref<1x128xf32, #tpu.memory_space<vmem>>, %arg4: memref<1x128xf32, #tpu.memory_space<vmem>>, %arg5: memref<128x384xbf16, #tpu.memory_space<vmem>>, %arg6: memref<1x384xf32, #tpu.memory_space<vmem>>, %arg7: memref<128x128xbf16, #tpu.memory_space<vmem>>, %arg8: memref<1x128xf32, #tpu.memory_space<vmem>>, %arg9: memref<1x128xf32, #tpu.memory_space<vmem>>, %arg10: memref<1x128xf32, #tpu.memory_space<vmem>>, %arg11: memref<128x256xbf16, #tpu.memory_space<vmem>>, %arg12: memref<1x256xf32, #tpu.memory_space<vmem>>, %arg13: memref<256x128xbf16, #tpu.memory_space<vmem>>, %arg14: memref<1x128xf32, #tpu.memory_space<vmem>>, %arg15: memref<8x128xf32, #tpu.memory_space<vmem>>) attributes {dimension_semantics = [#tpu.dimension_semantics<parallel>], iteration_bounds = array<i64: 2>, scalar_prefetch = 0 : i64, scratch_operands = 0 : i64, tpu.core_type = #tpu.core_type<tc>, window_params = [{transform_indices = @transform_0, window_bounds = array<i64: 8, 128>}, {pipeline_mode = #tpu.pipeline_mode<synchronous>, transform_indices = @transform_1, window_bounds = array<i64: 8, 8>}, {pipeline_mode = #tpu.pipeline_mode<synchronous>, transform_indices = @transform_2, window_bounds = array<i64: 1, 128>}, {pipeline_mode = #tpu.pipeline_mode<synchronous>, transform_indices = @transform_3, window_bounds = array<i64: 1, 128>}, {pipeline_mode = #tpu.pipeline_mode<synchronous>, transform_indices = @transform_4, window_bounds = array<i64: 128, 384>}, {pipeline_mode = #tpu.pipeline_mode<synchronous>, transform_indices = @transform_5, window_bounds = array<i64: 1, 384>}, {pipeline_mode = #tpu.pipeline_mode<synchronous>, transform_indices = @transform_6, window_bounds = array<i64: 128, 128>}, {pipeline_mode = #tpu.pipeline_mode<synchronous>, transform_indices = @transform_7, window_bounds = array<i64: 1, 128>}, {pipeline_mode = #tpu.pipeline_mode<synchronous>, transform_indices = @transform_8, window_bounds = array<i64: 1, 128>}, {pipeline_mode = #tpu.pipeline_mode<synchronous>, transform_indices = @transform_9, window_bounds = array<i64: 1, 128>}, {pipeline_mode = #tpu.pipeline_mode<synchronous>, transform_indices = @transform_10, window_bounds = array<i64: 128, 256>}, {pipeline_mode = #tpu.pipeline_mode<synchronous>, transform_indices = @transform_11, window_bounds = array<i64: 1, 256>}, {pipeline_mode = #tpu.pipeline_mode<synchronous>, transform_indices = @transform_12, window_bounds = array<i64: 256, 128>}, {pipeline_mode = #tpu.pipeline_mode<synchronous>, transform_indices = @transform_13, window_bounds = array<i64: 1, 128>}, {transform_indices = @transform_14, window_bounds = array<i64: 8, 128>}]} {
    %c0 = arith.constant 0 : index
    %c0_0 = arith.constant 0 : index
    %0 = vector.load %arg1[%c0, %c0_0] : memref<8x128xf32, #tpu.memory_space<vmem>>, vector<8x128xf32>
    %c0_1 = arith.constant 0 : index
    %c0_2 = arith.constant 0 : index
    %1 = vector.load %arg3[%c0_1, %c0_2] : memref<1x128xf32, #tpu.memory_space<vmem>>, vector<1x128xf32>
    %c0_3 = arith.constant 0 : index
    %c0_4 = arith.constant 0 : index
    %2 = vector.load %arg4[%c0_3, %c0_4] : memref<1x128xf32, #tpu.memory_space<vmem>>, vector<1x128xf32>
    %cst = arith.constant dense<0.000000e+00> : vector<8xf32>
    %3 = vector.multi_reduction <add>, %0, %cst [1] : vector<8x128xf32> to vector<8xf32>
    %4 = vector.shape_cast %3 : vector<8xf32> to vector<8x1xf32>
    %cst_5 = arith.constant 1.280000e+02 : f32
    %5 = vector.broadcast %cst_5 : f32 to vector<8x1xf32>
    %6 = arith.divf %4, %5 : vector<8x1xf32>
    %7 = vector.broadcast %6 : vector<8x1xf32> to vector<8x128xf32>
    %8 = arith.subf %0, %7 : vector<8x128xf32>
    %9 = arith.mulf %8, %8 : vector<8x128xf32>
    %cst_6 = arith.constant dense<0.000000e+00> : vector<8xf32>
    %10 = vector.multi_reduction <add>, %9, %cst_6 [1] : vector<8x128xf32> to vector<8xf32>
    %11 = vector.shape_cast %10 : vector<8xf32> to vector<8x1xf32>
    %cst_7 = arith.constant 1.280000e+02 : f32
    %12 = vector.broadcast %cst_7 : f32 to vector<8x1xf32>
    %13 = arith.divf %11, %12 : vector<8x1xf32>
    %cst_8 = arith.constant 9.99999974E-6 : f32
    %14 = vector.broadcast %cst_8 : f32 to vector<8x1xf32>
    %15 = arith.addf %13, %14 : vector<8x1xf32>
    %16 = math.rsqrt %15 : vector<8x1xf32>
    %17 = vector.broadcast %16 : vector<8x1xf32> to vector<8x128xf32>
    %18 = arith.mulf %8, %17 : vector<8x128xf32>
    %19 = vector.broadcast %1 : vector<1x128xf32> to vector<8x128xf32>
    %20 = arith.mulf %18, %19 : vector<8x128xf32>
    %21 = vector.broadcast %2 : vector<1x128xf32> to vector<8x128xf32>
    %22 = arith.addf %20, %21 : vector<8x128xf32>
    %23 = arith.truncf %22 : vector<8x128xf32> to vector<8x128xbf16>
    %c0_9 = arith.constant 0 : index
    %c0_10 = arith.constant 0 : index
    %24 = vector.load %arg5[%c0_9, %c0_10] : memref<128x384xbf16, #tpu.memory_space<vmem>>, vector<128x384xbf16>
    %cst_11 = arith.constant dense<0.000000e+00> : vector<8x384xf32>
    %25 = tpu.matmul %23, %24, %cst_11 {dimension_numbers = #tpu.dot_dimension_numbers<[1], [0], [0], [1], [0, 0, 1, 1], [], []>} : vector<8x128xbf16>, vector<128x384xbf16>, vector<8x384xf32> -> vector<8x384xf32>
    %c0_12 = arith.constant 0 : index
    %c0_13 = arith.constant 0 : index
    %26 = vector.load %arg6[%c0_12, %c0_13] : memref<1x384xf32, #tpu.memory_space<vmem>>, vector<1x384xf32>
    %27 = vector.broadcast %26 : vector<1x384xf32> to vector<8x384xf32>
    %28 = arith.addf %25, %27 : vector<8x384xf32>
    %29 = vector.extract_strided_slice %28 {offsets = [0, 0], sizes = [8, 128], strides = [1, 1]} : vector<8x384xf32> to vector<8x128xf32>
    %30 = arith.truncf %29 : vector<8x128xf32> to vector<8x128xbf16>
    %31 = vector.extract_strided_slice %28 {offsets = [0, 128], sizes = [8, 128], strides = [1, 1]} : vector<8x384xf32> to vector<8x128xf32>
    %32 = tpu.transpose %31, [1, 0] : vector<8x128xf32> -> vector<128x8xf32>
    %33 = arith.truncf %32 : vector<128x8xf32> to vector<128x8xbf16>
    %34 = vector.extract_strided_slice %28 {offsets = [0, 256], sizes = [8, 128], strides = [1, 1]} : vector<8x384xf32> to vector<8x128xf32>
    %35 = arith.truncf %34 : vector<8x128xf32> to vector<8x128xbf16>
    %c0_14 = arith.constant 0 : index
    %c0_15 = arith.constant 0 : index
    %36 = vector.load %arg2[%c0_14, %c0_15] : memref<8x8xf32, #tpu.memory_space<vmem>>, vector<8x8xf32>
    %cst_16 = arith.constant 0.000000e+00 : f32
    %37 = vector.broadcast %cst_16 : f32 to vector<8x128xf32>
    %38 = vector.extract_strided_slice %30 {offsets = [0, 0], sizes = [8, 32], strides = [1, 1]} : vector<8x128xbf16> to vector<8x32xbf16>
    %39 = vector.extract_strided_slice %33 {offsets = [0, 0], sizes = [32, 8], strides = [1, 1]} : vector<128x8xbf16> to vector<32x8xbf16>
    %cst_17 = arith.constant dense<0.000000e+00> : vector<8x8xf32>
    %40 = tpu.matmul %38, %39, %cst_17 {dimension_numbers = #tpu.dot_dimension_numbers<[1], [0], [0], [1], [0, 0, 1, 1], [], []>} : vector<8x32xbf16>, vector<32x8xbf16>, vector<8x8xf32> -> vector<8x8xf32>
    %41 = arith.addf %40, %36 : vector<8x8xf32>
    %cst_18 = arith.constant dense<0xFF800000> : vector<8xf32>
    %42 = vector.multi_reduction <maximumf>, %41, %cst_18 [1] : vector<8x8xf32> to vector<8xf32>
    %43 = vector.shape_cast %42 : vector<8xf32> to vector<8x1xf32>
    %44 = vector.broadcast %43 : vector<8x1xf32> to vector<8x8xf32>
    %45 = arith.subf %41, %44 : vector<8x8xf32>
    %46 = math.exp %45 : vector<8x8xf32>
    %cst_19 = arith.constant dense<0.000000e+00> : vector<8xf32>
    %47 = vector.multi_reduction <add>, %46, %cst_19 [1] : vector<8x8xf32> to vector<8xf32>
    %48 = vector.shape_cast %47 : vector<8xf32> to vector<8x1xf32>
    %49 = tpu.reciprocal %48 {approx = true} : vector<8x1xf32> -> vector<8x1xf32>
    %50 = vector.broadcast %49 : vector<8x1xf32> to vector<8x8xf32>
    %51 = arith.mulf %46, %50 : vector<8x8xf32>
    %52 = arith.truncf %51 : vector<8x8xf32> to vector<8x8xbf16>
    %53 = vector.extract_strided_slice %35 {offsets = [0, 0], sizes = [8, 32], strides = [1, 1]} : vector<8x128xbf16> to vector<8x32xbf16>
    %cst_20 = arith.constant dense<0.000000e+00> : vector<8x32xf32>
    %54 = tpu.matmul %52, %53, %cst_20 {dimension_numbers = #tpu.dot_dimension_numbers<[1], [0], [0], [1], [0, 0, 1, 1], [], []>} : vector<8x8xbf16>, vector<8x32xbf16>, vector<8x32xf32> -> vector<8x32xf32>
    %55 = arith.truncf %54 : vector<8x32xf32> to vector<8x32xbf16>
    %c0_21 = arith.constant 0 : index
    %c0_22 = arith.constant 0 : index
    %56 = vector.load %arg7[%c0_21, %c0_22] : memref<128x128xbf16, #tpu.memory_space<vmem>>, vector<32x128xbf16>
    %cst_23 = arith.constant dense<0.000000e+00> : vector<8x128xf32>
    %57 = tpu.matmul %55, %56, %cst_23 {dimension_numbers = #tpu.dot_dimension_numbers<[1], [0], [0], [1], [0, 0, 1, 1], [], []>} : vector<8x32xbf16>, vector<32x128xbf16>, vector<8x128xf32> -> vector<8x128xf32>
    %58 = arith.addf %37, %57 : vector<8x128xf32>
    %59 = vector.extract_strided_slice %30 {offsets = [0, 32], sizes = [8, 32], strides = [1, 1]} : vector<8x128xbf16> to vector<8x32xbf16>
    %60 = vector.extract_strided_slice %33 {offsets = [32, 0], sizes = [32, 8], strides = [1, 1]} : vector<128x8xbf16> to vector<32x8xbf16>
    %cst_24 = arith.constant dense<0.000000e+00> : vector<8x8xf32>
    %61 = tpu.matmul %59, %60, %cst_24 {dimension_numbers = #tpu.dot_dimension_numbers<[1], [0], [0], [1], [0, 0, 1, 1], [], []>} : vector<8x32xbf16>, vector<32x8xbf16>, vector<8x8xf32> -> vector<8x8xf32>
    %62 = arith.addf %61, %36 : vector<8x8xf32>
    %cst_25 = arith.constant dense<0xFF800000> : vector<8xf32>
    %63 = vector.multi_reduction <maximumf>, %62, %cst_25 [1] : vector<8x8xf32> to vector<8xf32>
    %64 = vector.shape_cast %63 : vector<8xf32> to vector<8x1xf32>
    %65 = vector.broadcast %64 : vector<8x1xf32> to vector<8x8xf32>
    %66 = arith.subf %62, %65 : vector<8x8xf32>
    %67 = math.exp %66 : vector<8x8xf32>
    %cst_26 = arith.constant dense<0.000000e+00> : vector<8xf32>
    %68 = vector.multi_reduction <add>, %67, %cst_26 [1] : vector<8x8xf32> to vector<8xf32>
    %69 = vector.shape_cast %68 : vector<8xf32> to vector<8x1xf32>
    %70 = tpu.reciprocal %69 {approx = true} : vector<8x1xf32> -> vector<8x1xf32>
    %71 = vector.broadcast %70 : vector<8x1xf32> to vector<8x8xf32>
    %72 = arith.mulf %67, %71 : vector<8x8xf32>
    %73 = arith.truncf %72 : vector<8x8xf32> to vector<8x8xbf16>
    %74 = vector.extract_strided_slice %35 {offsets = [0, 32], sizes = [8, 32], strides = [1, 1]} : vector<8x128xbf16> to vector<8x32xbf16>
    %cst_27 = arith.constant dense<0.000000e+00> : vector<8x32xf32>
    %75 = tpu.matmul %73, %74, %cst_27 {dimension_numbers = #tpu.dot_dimension_numbers<[1], [0], [0], [1], [0, 0, 1, 1], [], []>} : vector<8x8xbf16>, vector<8x32xbf16>, vector<8x32xf32> -> vector<8x32xf32>
    %76 = arith.truncf %75 : vector<8x32xf32> to vector<8x32xbf16>
    %c32 = arith.constant 32 : index
    %c0_28 = arith.constant 0 : index
    %77 = vector.load %arg7[%c32, %c0_28] : memref<128x128xbf16, #tpu.memory_space<vmem>>, vector<32x128xbf16>
    %cst_29 = arith.constant dense<0.000000e+00> : vector<8x128xf32>
    %78 = tpu.matmul %76, %77, %cst_29 {dimension_numbers = #tpu.dot_dimension_numbers<[1], [0], [0], [1], [0, 0, 1, 1], [], []>} : vector<8x32xbf16>, vector<32x128xbf16>, vector<8x128xf32> -> vector<8x128xf32>
    %79 = arith.addf %58, %78 : vector<8x128xf32>
    %80 = vector.extract_strided_slice %30 {offsets = [0, 64], sizes = [8, 32], strides = [1, 1]} : vector<8x128xbf16> to vector<8x32xbf16>
    %81 = vector.extract_strided_slice %33 {offsets = [64, 0], sizes = [32, 8], strides = [1, 1]} : vector<128x8xbf16> to vector<32x8xbf16>
    %cst_30 = arith.constant dense<0.000000e+00> : vector<8x8xf32>
    %82 = tpu.matmul %80, %81, %cst_30 {dimension_numbers = #tpu.dot_dimension_numbers<[1], [0], [0], [1], [0, 0, 1, 1], [], []>} : vector<8x32xbf16>, vector<32x8xbf16>, vector<8x8xf32> -> vector<8x8xf32>
    %83 = arith.addf %82, %36 : vector<8x8xf32>
    %cst_31 = arith.constant dense<0xFF800000> : vector<8xf32>
    %84 = vector.multi_reduction <maximumf>, %83, %cst_31 [1] : vector<8x8xf32> to vector<8xf32>
    %85 = vector.shape_cast %84 : vector<8xf32> to vector<8x1xf32>
    %86 = vector.broadcast %85 : vector<8x1xf32> to vector<8x8xf32>
    %87 = arith.subf %83, %86 : vector<8x8xf32>
    %88 = math.exp %87 : vector<8x8xf32>
    %cst_32 = arith.constant dense<0.000000e+00> : vector<8xf32>
    %89 = vector.multi_reduction <add>, %88, %cst_32 [1] : vector<8x8xf32> to vector<8xf32>
    %90 = vector.shape_cast %89 : vector<8xf32> to vector<8x1xf32>
    %91 = tpu.reciprocal %90 {approx = true} : vector<8x1xf32> -> vector<8x1xf32>
    %92 = vector.broadcast %91 : vector<8x1xf32> to vector<8x8xf32>
    %93 = arith.mulf %88, %92 : vector<8x8xf32>
    %94 = arith.truncf %93 : vector<8x8xf32> to vector<8x8xbf16>
    %95 = vector.extract_strided_slice %35 {offsets = [0, 64], sizes = [8, 32], strides = [1, 1]} : vector<8x128xbf16> to vector<8x32xbf16>
    %cst_33 = arith.constant dense<0.000000e+00> : vector<8x32xf32>
    %96 = tpu.matmul %94, %95, %cst_33 {dimension_numbers = #tpu.dot_dimension_numbers<[1], [0], [0], [1], [0, 0, 1, 1], [], []>} : vector<8x8xbf16>, vector<8x32xbf16>, vector<8x32xf32> -> vector<8x32xf32>
    %97 = arith.truncf %96 : vector<8x32xf32> to vector<8x32xbf16>
    %c64 = arith.constant 64 : index
    %c0_34 = arith.constant 0 : index
    %98 = vector.load %arg7[%c64, %c0_34] : memref<128x128xbf16, #tpu.memory_space<vmem>>, vector<32x128xbf16>
    %cst_35 = arith.constant dense<0.000000e+00> : vector<8x128xf32>
    %99 = tpu.matmul %97, %98, %cst_35 {dimension_numbers = #tpu.dot_dimension_numbers<[1], [0], [0], [1], [0, 0, 1, 1], [], []>} : vector<8x32xbf16>, vector<32x128xbf16>, vector<8x128xf32> -> vector<8x128xf32>
    %100 = arith.addf %79, %99 : vector<8x128xf32>
    %101 = vector.extract_strided_slice %30 {offsets = [0, 96], sizes = [8, 32], strides = [1, 1]} : vector<8x128xbf16> to vector<8x32xbf16>
    %102 = vector.extract_strided_slice %33 {offsets = [96, 0], sizes = [32, 8], strides = [1, 1]} : vector<128x8xbf16> to vector<32x8xbf16>
    %cst_36 = arith.constant dense<0.000000e+00> : vector<8x8xf32>
    %103 = tpu.matmul %101, %102, %cst_36 {dimension_numbers = #tpu.dot_dimension_numbers<[1], [0], [0], [1], [0, 0, 1, 1], [], []>} : vector<8x32xbf16>, vector<32x8xbf16>, vector<8x8xf32> -> vector<8x8xf32>
    %104 = arith.addf %103, %36 : vector<8x8xf32>
    %cst_37 = arith.constant dense<0xFF800000> : vector<8xf32>
    %105 = vector.multi_reduction <maximumf>, %104, %cst_37 [1] : vector<8x8xf32> to vector<8xf32>
    %106 = vector.shape_cast %105 : vector<8xf32> to vector<8x1xf32>
    %107 = vector.broadcast %106 : vector<8x1xf32> to vector<8x8xf32>
    %108 = arith.subf %104, %107 : vector<8x8xf32>
    %109 = math.exp %108 : vector<8x8xf32>
    %cst_38 = arith.constant dense<0.000000e+00> : vector<8xf32>
    %110 = vector.multi_reduction <add>, %109, %cst_38 [1] : vector<8x8xf32> to vector<8xf32>
    %111 = vector.shape_cast %110 : vector<8xf32> to vector<8x1xf32>
    %112 = tpu.reciprocal %111 {approx = true} : vector<8x1xf32> -> vector<8x1xf32>
    %113 = vector.broadcast %112 : vector<8x1xf32> to vector<8x8xf32>
    %114 = arith.mulf %109, %113 : vector<8x8xf32>
    %115 = arith.truncf %114 : vector<8x8xf32> to vector<8x8xbf16>
    %116 = vector.extract_strided_slice %35 {offsets = [0, 96], sizes = [8, 32], strides = [1, 1]} : vector<8x128xbf16> to vector<8x32xbf16>
    %cst_39 = arith.constant dense<0.000000e+00> : vector<8x32xf32>
    %117 = tpu.matmul %115, %116, %cst_39 {dimension_numbers = #tpu.dot_dimension_numbers<[1], [0], [0], [1], [0, 0, 1, 1], [], []>} : vector<8x8xbf16>, vector<8x32xbf16>, vector<8x32xf32> -> vector<8x32xf32>
    %118 = arith.truncf %117 : vector<8x32xf32> to vector<8x32xbf16>
    %c96 = arith.constant 96 : index
    %c0_40 = arith.constant 0 : index
    %119 = vector.load %arg7[%c96, %c0_40] : memref<128x128xbf16, #tpu.memory_space<vmem>>, vector<32x128xbf16>
    %cst_41 = arith.constant dense<0.000000e+00> : vector<8x128xf32>
    %120 = tpu.matmul %118, %119, %cst_41 {dimension_numbers = #tpu.dot_dimension_numbers<[1], [0], [0], [1], [0, 0, 1, 1], [], []>} : vector<8x32xbf16>, vector<32x128xbf16>, vector<8x128xf32> -> vector<8x128xf32>
    %121 = arith.addf %100, %120 : vector<8x128xf32>
    %c0_42 = arith.constant 0 : index
    %c0_43 = arith.constant 0 : index
    %122 = vector.load %arg8[%c0_42, %c0_43] : memref<1x128xf32, #tpu.memory_space<vmem>>, vector<1x128xf32>
    %123 = vector.broadcast %122 : vector<1x128xf32> to vector<8x128xf32>
    %124 = arith.addf %121, %123 : vector<8x128xf32>
    %125 = arith.addf %0, %124 : vector<8x128xf32>
    %c0_44 = arith.constant 0 : index
    %c0_45 = arith.constant 0 : index
    %126 = vector.load %arg9[%c0_44, %c0_45] : memref<1x128xf32, #tpu.memory_space<vmem>>, vector<1x128xf32>
    %c0_46 = arith.constant 0 : index
    %c0_47 = arith.constant 0 : index
    %127 = vector.load %arg10[%c0_46, %c0_47] : memref<1x128xf32, #tpu.memory_space<vmem>>, vector<1x128xf32>
    %cst_48 = arith.constant dense<0.000000e+00> : vector<8xf32>
    %128 = vector.multi_reduction <add>, %125, %cst_48 [1] : vector<8x128xf32> to vector<8xf32>
    %129 = vector.shape_cast %128 : vector<8xf32> to vector<8x1xf32>
    %cst_49 = arith.constant 1.280000e+02 : f32
    %130 = vector.broadcast %cst_49 : f32 to vector<8x1xf32>
    %131 = arith.divf %129, %130 : vector<8x1xf32>
    %132 = vector.broadcast %131 : vector<8x1xf32> to vector<8x128xf32>
    %133 = arith.subf %125, %132 : vector<8x128xf32>
    %134 = arith.mulf %133, %133 : vector<8x128xf32>
    %cst_50 = arith.constant dense<0.000000e+00> : vector<8xf32>
    %135 = vector.multi_reduction <add>, %134, %cst_50 [1] : vector<8x128xf32> to vector<8xf32>
    %136 = vector.shape_cast %135 : vector<8xf32> to vector<8x1xf32>
    %cst_51 = arith.constant 1.280000e+02 : f32
    %137 = vector.broadcast %cst_51 : f32 to vector<8x1xf32>
    %138 = arith.divf %136, %137 : vector<8x1xf32>
    %cst_52 = arith.constant 9.99999974E-6 : f32
    %139 = vector.broadcast %cst_52 : f32 to vector<8x1xf32>
    %140 = arith.addf %138, %139 : vector<8x1xf32>
    %141 = math.rsqrt %140 : vector<8x1xf32>
    %142 = vector.broadcast %141 : vector<8x1xf32> to vector<8x128xf32>
    %143 = arith.mulf %133, %142 : vector<8x128xf32>
    %144 = vector.broadcast %126 : vector<1x128xf32> to vector<8x128xf32>
    %145 = arith.mulf %143, %144 : vector<8x128xf32>
    %146 = vector.broadcast %127 : vector<1x128xf32> to vector<8x128xf32>
    %147 = arith.addf %145, %146 : vector<8x128xf32>
    %148 = arith.truncf %147 : vector<8x128xf32> to vector<8x128xbf16>
    %c0_53 = arith.constant 0 : index
    %c0_54 = arith.constant 0 : index
    %149 = vector.load %arg11[%c0_53, %c0_54] : memref<128x256xbf16, #tpu.memory_space<vmem>>, vector<128x256xbf16>
    %cst_55 = arith.constant dense<0.000000e+00> : vector<8x256xf32>
    %150 = tpu.matmul %148, %149, %cst_55 {dimension_numbers = #tpu.dot_dimension_numbers<[1], [0], [0], [1], [0, 0, 1, 1], [], []>} : vector<8x128xbf16>, vector<128x256xbf16>, vector<8x256xf32> -> vector<8x256xf32>
    %c0_56 = arith.constant 0 : index
    %c0_57 = arith.constant 0 : index
    %151 = vector.load %arg12[%c0_56, %c0_57] : memref<1x256xf32, #tpu.memory_space<vmem>>, vector<1x256xf32>
    %152 = vector.broadcast %151 : vector<1x256xf32> to vector<8x256xf32>
    %153 = arith.addf %150, %152 : vector<8x256xf32>
    %cst_58 = arith.constant 5.000000e-01 : f32
    %154 = vector.broadcast %cst_58 : f32 to vector<8x256xf32>
    %155 = arith.mulf %154, %153 : vector<8x256xf32>
    %cst_59 = arith.constant 4.471500e-02 : f32
    %156 = vector.broadcast %cst_59 : f32 to vector<8x256xf32>
    %157 = arith.mulf %156, %153 : vector<8x256xf32>
    %158 = arith.mulf %157, %153 : vector<8x256xf32>
    %159 = arith.mulf %158, %153 : vector<8x256xf32>
    %160 = arith.addf %153, %159 : vector<8x256xf32>
    %cst_60 = arith.constant 0.797884583 : f32
    %161 = vector.broadcast %cst_60 : f32 to vector<8x256xf32>
    %162 = arith.mulf %161, %160 : vector<8x256xf32>
    %163 = math.tanh %162 : vector<8x256xf32>
    %cst_61 = arith.constant 1.000000e+00 : f32
    %164 = vector.broadcast %cst_61 : f32 to vector<8x256xf32>
    %165 = arith.addf %164, %163 : vector<8x256xf32>
    %166 = arith.mulf %155, %165 : vector<8x256xf32>
    %167 = arith.truncf %166 : vector<8x256xf32> to vector<8x256xbf16>
    %c0_62 = arith.constant 0 : index
    %c0_63 = arith.constant 0 : index
    %168 = vector.load %arg13[%c0_62, %c0_63] : memref<256x128xbf16, #tpu.memory_space<vmem>>, vector<256x128xbf16>
    %cst_64 = arith.constant dense<0.000000e+00> : vector<8x128xf32>
    %169 = tpu.matmul %167, %168, %cst_64 {dimension_numbers = #tpu.dot_dimension_numbers<[1], [0], [0], [1], [0, 0, 1, 1], [], []>} : vector<8x256xbf16>, vector<256x128xbf16>, vector<8x128xf32> -> vector<8x128xf32>
    %c0_65 = arith.constant 0 : index
    %c0_66 = arith.constant 0 : index
    %170 = vector.load %arg14[%c0_65, %c0_66] : memref<1x128xf32, #tpu.memory_space<vmem>>, vector<1x128xf32>
    %171 = vector.broadcast %170 : vector<1x128xf32> to vector<8x128xf32>
    %172 = arith.addf %169, %171 : vector<8x128xf32>
    %173 = arith.addf %125, %172 : vector<8x128xf32>
    %c0_67 = arith.constant 0 : index
    %c0_68 = arith.constant 0 : index
    %174 = vector.load %arg15[%c0_67, %c0_68] : memref<8x128xf32, #tpu.memory_space<vmem>>, vector<8x128xf32>
    tpu.vector_store %arg15[%c0_67, %c0_68], %173 {strides = array<i32>} : memref<8x128xf32, #tpu.memory_space<vmem>>, vector<8x128xf32>,
    return
  }
  func.func @transform_0(%arg0: i32) -> (i32, i32) {
    %c0_i32 = arith.constant 0 : i32
    %c0_i32_0 = arith.constant 0 : i32
    return %arg0, %c0_i32 : i32, i32
  }
  func.func @transform_1(%arg0: i32) -> (i32, i32) {
    %c0_i32 = arith.constant 0 : i32
    %c0_i32_0 = arith.constant 0 : i32
    %c0_i32_1 = arith.constant 0 : i32
    return %c0_i32, %c0_i32_0 : i32, i32
  }
  func.func @transform_2(%arg0: i32) -> (i32, i32) {
    %c0_i32 = arith.constant 0 : i32
    %c0_i32_0 = arith.constant 0 : i32
    %c0_i32_1 = arith.constant 0 : i32
    return %c0_i32, %c0_i32_0 : i32, i32
  }
  func.func @transform_3(%arg0: i32) -> (i32, i32) {
    %c0_i32 = arith.constant 0 : i32
    %c0_i32_0 = arith.constant 0 : i32
    %c0_i32_1 = arith.constant 0 : i32
    return %c0_i32, %c0_i32_0 : i32, i32
  }
  func.func @transform_4(%arg0: i32) -> (i32, i32) {
    %c0_i32 = arith.constant 0 : i32
    %c0_i32_0 = arith.constant 0 : i32
    %c0_i32_1 = arith.constant 0 : i32
    return %c0_i32, %c0_i32_0 : i32, i32
  }
  func.func @transform_5(%arg0: i32) -> (i32, i32) {
    %c0_i32 = arith.constant 0 : i32
    %c0_i32_0 = arith.constant 0 : i32
    %c0_i32_1 = arith.constant 0 : i32
    return %c0_i32, %c0_i32_0 : i32, i32
  }
  func.func @transform_6(%arg0: i32) -> (i32, i32) {
    %c0_i32 = arith.constant 0 : i32
    %c0_i32_0 = arith.constant 0 : i32
    %c0_i32_1 = arith.constant 0 : i32
    return %c0_i32, %c0_i32_0 : i32, i32
  }
  func.func @transform_7(%arg0: i32) -> (i32, i32) {
    %c0_i32 = arith.constant 0 : i32
    %c0_i32_0 = arith.constant 0 : i32
    %c0_i32_1 = arith.constant 0 : i32
    return %c0_i32, %c0_i32_0 : i32, i32
  }
  func.func @transform_8(%arg0: i32) -> (i32, i32) {
    %c0_i32 = arith.constant 0 : i32
    %c0_i32_0 = arith.constant 0 : i32
    %c0_i32_1 = arith.constant 0 : i32
    return %c0_i32, %c0_i32_0 : i32, i32
  }
  func.func @transform_9(%arg0: i32) -> (i32, i32) {
    %c0_i32 = arith.constant 0 : i32
    %c0_i32_0 = arith.constant 0 : i32
    %c0_i32_1 = arith.constant 0 : i32
    return %c0_i32, %c0_i32_0 : i32, i32
  }
  func.func @transform_10(%arg0: i32) -> (i32, i32) {
    %c0_i32 = arith.constant 0 : i32
    %c0_i32_0 = arith.constant 0 : i32
    %c0_i32_1 = arith.constant 0 : i32
    return %c0_i32, %c0_i32_0 : i32, i32
  }
  func.func @transform_11(%arg0: i32) -> (i32, i32) {
    %c0_i32 = arith.constant 0 : i32
    %c0_i32_0 = arith.constant 0 : i32
    %c0_i32_1 = arith.constant 0 : i32
    return %c0_i32, %c0_i32_0 : i32, i32
  }
  func.func @transform_12(%arg0: i32) -> (i32, i32) {
    %c0_i32 = arith.constant 0 : i32
    %c0_i32_0 = arith.constant 0 : i32
    %c0_i32_1 = arith.constant 0 : i32
    return %c0_i32, %c0_i32_0 : i32, i32
  }
  func.func @transform_13(%arg0: i32) -> (i32, i32) {
    %c0_i32 = arith.constant 0 : i32
    %c0_i32_0 = arith.constant 0 : i32
    %c0_i32_1 = arith.constant 0 : i32
    return %c0_i32, %c0_i32_0 : i32, i32
  }
  func.func @transform_14(%arg0: i32) -> (i32, i32) {
    %c0_i32 = arith.constant 0 : i32
    %c0_i32_0 = arith.constant 0 : i32
    return %arg0, %c0_i32 : i32, i32
  }
}

</mosaic_0001>

<bundles_post_ra>
// kernel: tpu_custom_call.1
= control target key start
LH: loop header
LB: loop body
LE: loop exit
PB: predicated region body
PF: predicated region fallthrough
CT: control target
= control target key end

     0   :  { %s3379_s0 = inlined_call_operand.hbm [shape: f32[16,128], index: 0, kind: input, shape index: {}]   ;;  %s3380_s1 = inlined_call_operand.hbm [shape: f32[8,8], index: 1, kind: input, shape index: {}]   ;;  %s3381_s2 = inlined_call_operand.vmem [shape: f32[1,128], index: 2, kind: input, shape index: {}]   ;;  %s3382_s3 = inlined_call_operand.vmem [shape: f32[1,128], index: 3, kind: input, shape index: {}]   ;;  %s3383_s4 = inlined_call_operand.hbm [shape: bf16[128,384], index: 4, kind: input, shape index: {}]   ;;  %s3384_s5 = inlined_call_operand.vmem [shape: f32[1,384], index: 5, kind: input, shape index: {}]   ;;  %s3385_s6 = inlined_call_operand.hbm [shape: bf16[128,128], index: 6, kind: input, shape index: {}]   ;;  %s3386_s7 = inlined_call_operand.vmem [shape: f32[1,128], index: 7, kind: input, shape index: {}]   ;;  %s3387_s8 = inlined_call_operand.vmem [shape: f32[1,128], index: 8, kind: input, shape index: {}]   ;;  %s3388_s9 = inlined_call_operand.vmem [shape: f32[1,128], index: 9, kind: input, shape index: {}]   ;;  %s3389_s10 = inlined_call_operand.hbm [shape: bf16[128,256], index: 10, kind: input, shape index: {}]   ;;  %s3390_s11 = inlined_call_operand.vmem [shape: f32[1,256], index: 11, kind: input, shape index: {}]   ;;  %s3391_s12 = inlined_call_operand.hbm [shape: bf16[256,128], index: 12, kind: input, shape index: {}]   ;;  %s3392_s13 = inlined_call_operand.vmem [shape: f32[1,128], index: 13, kind: input, shape index: {}]   ;;  %s3393_s14 = inlined_call_operand.hbm [shape: f32[16,128], index: 14, kind: output, shape index: {}]  }
   0x1   :  { %3400 = sst [smem:[#allocation19_spill]] %s3380_s1 }
   0x2   :  { %3401 = sst [smem:[#allocation20_spill]] %s3385_s6 }
   0x3   :  { %3402 = sst [smem:[#allocation21_spill]] %s3388_s9 }
   0x4   :  { %3403 = sst [smem:[#allocation22_spill]] %s3390_s11 }
   0x5   :  { %3404 = sst [smem:[#allocation23_spill]] %s3392_s13 }
   0x6   :  { %3405 = sst [smem:[#allocation24_spill]] %s3393_s14 }
   0x7   :  { %19 = vsyncpa [#allocation3], 0 }
   0x8   :  { %21 = vsyncpa [#allocation3 + $0x1], 0 }
   0x9   :  { %22 = vsyncpa [#allocation6], 0 }
   0xa   :  { %23 = vsyncpa [#allocation9], 0 }
   0xb   :  { %24 = vsyncpa [#allocation12], 0 }
   0xc   :  { %25 = vsyncpa [#allocation4], 0 }
   0xd   :  { %27 = vsyncpa [#allocation4 + $0x1], 0  ;;  %s2896_s29 = smov 0   ;;  %s2898_s30 = smov 0  }
   0xe   :  { %s2900_s15 = smov 0   ;;  %s2902_s16 = smov 0  }
   0xf LB: > { %s2802_s17 = smov [#allocation5]   ;;  %s2917_s19 = sadd.s32 4294967295, %s2800_s16   ;;  %s2800_s16 = sphi %s2902_s16, %s3435_s16   ;;  %s2796_s15 = sphi %s2900_s15, %s3434_s15   ;;  %s2792_s30 = sphi %s2898_s30, %s3433_s30   ;;  %s2788_s29 = sphi %s2896_s29, %s3432_s29  }
  0x10   : > { %s376_s18 = sshll.u32 %s2802_s17, 4  ;;  %p2065_p0 = scmp.ge.s32.totalorder %s2800_s16, 1  ;;  %s377_s18 = int_to_ptr.vmem [resolvable:$true] %s376_s18 }
  0x11   : > { %p3395_p1 = scmp.eq.s32.totalorder %s2917_s19, 0  ;;  %p363_p2 = scmp.lt.s32.totalorder %s2800_s16, 3 }
  0x12   : > { %s2803_s21 = smov [#allocation8]   ;;  %s2804_s24 = smov [#allocation7]  }
  0x13   : > { %p2922_p3 = pnand %p2065_p0, %p363_p2  ;;  %s408_s22 = sshll.u32 %s2803_s21, 4  ;;  %s2929_s22 = int_to_ptr.vmem [resolvable:$true] %s408_s22 }
  0x14   : > { %s392_s25 = sshll.u32 %s2804_s24, 4  ;;  %s3408_s1 = sld [smem:[#allocation19_spill]]  ;;  %s2937_s25 = int_to_ptr.vmem [resolvable:$true] %s392_s25 }
  0x15   : > { %s3406_s20 = scalar_select %p2922_p3, 1, 0 }
  0x16   : > { %p2363_p5 = pneg %p2922_p3 }
  0x18   : > { %p2933_p6 = pnand %p2363_p5, %p3395_p1 }
  0x1a   : > { %s2552_s28 = scalar_lea.hbm %s3408_s1, 128  ;;  %p2947_p8 = pneg %p2933_p6 }
  0x1b   : > { %p2553_p7 = scmp.ne.s32.totalorder %s3408_s1, %s2552_s28  ;;  %p2559_p11 = scmp.lt.u32.totalorder %s2552_s28, %s3408_s1 }
  0x1d   : > { %p2555_p9 = pnand %p2947_p8, %p2553_p7 }
  0x1f   : > { %p2556_p10 = pneg %p2555_p9 }
  0x21   : > { %p2561_p12 = pnand %p2559_p11, %p2556_p10 }
  0x23   : > { %2564 = shalt.err (!%p2561_p12)
}
  0x24   : > { %s2565_s26 = scalar_lea.vmem %s377_s18, 128  ;;  %p2573_p5 = scmp.lt.s32.totalorder %s377_s18, %s377_s18 }
  0x25   : > { %p2566_p13 = scmp.ne.s32.totalorder %s377_s18, %s2565_s26  ;;  %p2574_p4 = scmp.lt.s32.totalorder %s2565_s26, %s2565_s26 }
  0x27   : > { %p2568_p0 = pnand %p2566_p13, %p2947_p8  ;;  %p2575_p1 = por %p2574_p4, %p2573_p5 }
  0x29   : > { %p2569_p2 = pneg %p2568_p0 }
  0x2b   : > { %p2576_p3 = pnand %p2575_p1, %p2569_p2 }
  0x2d   : > { %2579 = shalt.err (!%p2576_p3)
}
  0x2e   : > { %2366 = dma.hbm_to_vmem [thread:$0]  (!%p2933_p6), %s3408_s1, 128, %s377_s18, [#allocation6]  }
  0x2f   : > { %s3410_s6 = sld [smem:[#allocation20_spill]] }
  0x35   : > { %s2580_s17 = scalar_lea.hbm %s3410_s6, 1024 }
  0x36   : > { %p2581_p7 = scmp.ne.s32.totalorder %s3410_s6, %s2580_s17  ;;  %p2587_p1 = scmp.lt.u32.totalorder %s2580_s17, %s3410_s6 }
  0x38   : > { %p2583_p9 = pnand %p2581_p7, %p2947_p8 }
  0x3a   : > { %p2584_p4 = pneg %p2583_p9 }
  0x3c   : > { %p2589_p3 = pnand %p2587_p1, %p2584_p4 }
  0x3e   : > { %2592 = shalt.err (!%p2589_p3)
}
  0x3f   : > { %s2593_s18 = scalar_lea.vmem %s2929_s22, 1024  ;;  %p2601_p13 = scmp.lt.s32.totalorder %s2929_s22, %s2929_s22 }
  0x40   : > { %p2594_p10 = scmp.ne.s32.totalorder %s2929_s22, %s2593_s18  ;;  %p2602_p0 = scmp.lt.s32.totalorder %s2593_s18, %s2593_s18 }
  0x42   : > { %p2596_p11 = pnand %p2594_p10, %p2947_p8  ;;  %p2603_p2 = por %p2602_p0, %p2601_p13 }
  0x44   : > { %p2597_p12 = pneg %p2596_p11 }
  0x46   : > { %p2604_p5 = pnand %p2603_p2, %p2597_p12 }
  0x48   : > { %2607 = shalt.err (!%p2604_p5)
}
  0x49   : > { %s3397_s11 = smov 64   ;;  %s3398_s9 = smov 4  }
  0x4a   : > { %2372 = dma.hbm_to_vmem [thread:$0]  (!%p2933_p6), %s3410_s6, 1024, %s2929_s22, [#allocation9], %s3397_s11, %s3397_s11, %s3398_s9  }
  0x4b   : > { %s2608_s17 = scalar_lea.hbm %s3383_s4, 3072 }
  0x4c   : > { %p2609_p7 = scmp.ne.s32.totalorder %s3383_s4, %s2608_s17  ;;  %p2615_p1 = scmp.lt.u32.totalorder %s2608_s17, %s3383_s4 }
  0x4e   : > { %p2611_p9 = pnand %p2609_p7, %p2947_p8 }
  0x50   : > { %p2612_p4 = pneg %p2611_p9 }
  0x52   : > { %p2617_p3 = pnand %p2615_p1, %p2612_p4 }
  0x54   : > { %2620 = shalt.err (!%p2617_p3)
}
  0x55   : > { %s2621_s22 = scalar_lea.vmem %s2937_s25, 3072  ;;  %p2629_p13 = scmp.lt.s32.totalorder %s2937_s25, %s2937_s25 }
  0x56   : > { %p2622_p10 = scmp.ne.s32.totalorder %s2937_s25, %s2621_s22  ;;  %p2630_p0 = scmp.lt.s32.totalorder %s2621_s22, %s2621_s22 }
  0x58   : > { %p2624_p11 = pnand %p2622_p10, %p2947_p8  ;;  %p2631_p2 = por %p2630_p0, %p2629_p13 }
  0x5a   : > { %p2625_p12 = pneg %p2624_p11 }
  0x5c   : > { %p2632_p5 = pnand %p2631_p2, %p2625_p12 }
  0x5e   : > { %2635 = shalt.err (!%p2632_p5)
}
  0x5f   : > { %s2807_s14 = smov 192   ;;  %s2808_s1 = smov 12  }
  0x60   : > { %2369 = dma.hbm_to_vmem [thread:$0]  (!%p2933_p6), %s3383_s4, 3072, %s2937_s25, [#allocation6], %s2807_s14, %s2807_s14, %s2808_s1  }
  0x61   : > { %s2809_s28 = smov [#allocation10]   ;;  %s2636_s18 = scalar_lea.hbm %s3389_s10, 2048 }
  0x62   : > { %s430_s17 = sshll.u32 %s2809_s28, 4  ;;  %p2637_p7 = scmp.ne.s32.totalorder %s3389_s10, %s2636_s18  ;;  %s431_s17 = int_to_ptr.vmem [resolvable:$true] %s430_s17 }
  0x63   : > { %p2643_p1 = scmp.lt.u32.totalorder %s2636_s18, %s3389_s10 }
  0x64   : > { %p2639_p9 = pnand %p2637_p7, %p2947_p8 }
  0x66   : > { %p2640_p4 = pneg %p2639_p9 }
  0x68   : > { %p2645_p3 = pnand %p2643_p1, %p2640_p4 }
  0x6a   : > { %2648 = shalt.err (!%p2645_p3)
}
  0x6b   : > { %s2649_s25 = scalar_lea.vmem %s431_s17, 2048  ;;  %p2657_p13 = scmp.lt.s32.totalorder %s431_s17, %s431_s17 }
  0x6c   : > { %p2650_p10 = scmp.ne.s32.totalorder %s431_s17, %s2649_s25  ;;  %p2658_p0 = scmp.lt.s32.totalorder %s2649_s25, %s2649_s25 }
  0x6e   : > { %p2652_p11 = pnand %p2650_p10, %p2947_p8  ;;  %p2659_p2 = por %p2658_p0, %p2657_p13 }
  0x70   : > { %p2653_p12 = pneg %p2652_p11 }
  0x72   : > { %p2660_p5 = pnand %p2659_p2, %p2653_p12 }
  0x74   : > { %2663 = shalt.err (!%p2660_p5)
}
  0x75   : > { %s2810_s11 = smov 128   ;;  %s2811_s14 = smov 8  }
  0x76   : > { %2375 = dma.hbm_to_vmem [thread:$0]  (!%p2933_p6), %s3389_s10, 2048, %s431_s17, [#allocation9], %s2810_s11, %s2810_s11, %s2811_s14  }
  0x77   : > { %s2812_s1 = smov [#allocation11]   ;;  %s2664_s24 = scalar_lea.hbm %s3391_s12, 2048 }
  0x78   : > { %s446_s27 = sshll.u32 %s2812_s1, 4  ;;  %p2665_p7 = scmp.ne.s32.totalorder %s3391_s12, %s2664_s24  ;;  %s447_s27 = int_to_ptr.vmem [resolvable:$true] %s446_s27 }
  0x79   : > { %p2671_p1 = scmp.lt.u32.totalorder %s2664_s24, %s3391_s12 }
  0x7a   : > { %p2667_p9 = pnand %p2665_p7, %p2947_p8 }
  0x7c   : > { %p2668_p4 = pneg %p2667_p9 }
  0x7e   : > { %p2673_p3 = pnand %p2671_p1, %p2668_p4 }
  0x80   : > { %2676 = shalt.err (!%p2673_p3)
}
  0x81   : > { %s2677_s17 = scalar_lea.vmem %s447_s27, 2048  ;;  %p2685_p13 = scmp.lt.s32.totalorder %s447_s27, %s447_s27 }
  0x82   : > { %p2678_p10 = scmp.ne.s32.totalorder %s447_s27, %s2677_s17  ;;  %p2686_p0 = scmp.lt.s32.totalorder %s2677_s17, %s2677_s17 }
  0x84   : > { %p2680_p11 = pnand %p2678_p10, %p2947_p8  ;;  %p2687_p2 = por %p2686_p0, %p2685_p13 }
  0x86   : > { %p2681_p12 = pneg %p2680_p11 }
  0x88   : > { %p2688_p5 = pnand %p2687_p2, %p2681_p12 }
  0x8a   : > { %2691 = shalt.err (!%p2688_p5)
}
  0x8b   : > { %s3411_s11 = smov 4   ;;  %s3412_s14 = smov 64  }
  0x8c   : > { %2378 = dma.hbm_to_vmem [thread:$0]  (!%p2933_p6), %s3391_s12, 2048, %s447_s27, [#allocation12], %s3412_s14, %s3412_s14, %s3411_s11  }
  0x8d   : > { %s2064_s23 = sadd.s32 4294967294, %s2800_s16   ;;  %s3053_s21 = sadd.s32 1, %s2800_s16  }
  0x8e   : > { %s40_s1 = sadd.s32 1, %s2796_s15  ;;  %s37_s13 = ssub.s32 %s2800_s16, %s3053_s21 }
  0x8f   : > { %p47_p8 = scmp.ne.s32.totalorder %s2796_s15, %s2792_s30  ;;  %p38_p7 = scmp.eq.s32.totalorder %s37_s13, 0 }
  0x90   : > { %p48_p9 = scmp.eq.s32.totalorder %s2800_s16, 0  ;;  %p53_p4 = scmp.ne.s32.totalorder %s2792_s30, %s2788_s29 }
  0x91   : > { %p350_p1 = scmp.eq.s32.totalorder %s2917_s19, 1  ;;  %p3413_p10 = scmp.eq.s32.totalorder %s2917_s19, 0 }
  0x92   : > { %s3065_s28 = scalar_select %p38_p7, %s2796_s15, %s40_s1  }
  0x93   : > { %p49_p3 = por %p48_p9, %p47_p8  ;;  %p3069_p11 = por %p3413_p10, %p53_p4 }
  0x94   : > { %p3073_p6 = por %p350_p1, %p47_p8  ;;  %p356_p12 = scmp.eq.s32.totalorder %s2064_s23, 1 }
  0x95   : > { %p2392_p13 = scmp.lt.s32.totalorder %s2800_s16, 2  ;;  %s463_s26 = sand.u32 1, %s2796_s15  }
  0x96   : > { %s3415_s27 = scalar_select %p3073_p6, 1, 0 }
  0x97   : > { %p3079_p0 = por %p356_p12, %p53_p4  ;;  %s2072_s22 = sshll.u32 %s463_s26, 3 }
  0x98   : > { %s2073_s25 = sshll.u32 %s2800_s16, 7  ;;  %s467_s6 = scalar_lea.vmem [#allocation2], %s2072_s22 }
  0x99   : > { %s3416_s18 = scalar_select %p3079_p0, 1, 0 }
  0x9a   : > { %s3087_s14 = scalar_lea.hbm %s3379_s0, %s2073_s25  ;;  %s474_s9 = sshll.u32 %s467_s6, 4  ;;  %s3093_s9 = int_to_ptr.vmem [resolvable:$true] %s474_s9 }
  0x9b   : > { %p3089_p2 = pnand %p2392_p13, %p49_p3  ;;  %s464_s1 = scalar_lea.sflag [#allocation3], %s463_s26 }
  0x9c   : > { %s2692_s13 = scalar_lea.hbm %s3087_s14, 128  ;;  %s2697_s17 = scalar_lea.hbm %s3379_s0, 256 }
  0x9d   : > { %p2693_p5 = scmp.ne.s32.totalorder %s3087_s14, %s2692_s13  ;;  %p2694_p8 = pneg %p3089_p2 }
  0x9e   : > { %p2698_p4 = scmp.lt.u32.totalorder %s3087_s14, %s3379_s0  ;;  %p2699_p1 = scmp.lt.u32.totalorder %s2697_s17, %s2692_s13 }
  0x9f   : > { %p2695_p7 = pnand %p2694_p8, %p2693_p5  ;;  %p2701_p10 = scmp.lt.u32.totalorder %s2692_s13, %s3087_s14 }
  0xa0   : > { %p2700_p3 = por %p2699_p1, %p2698_p4 }
  0xa1   : > { %p2696_p9 = pneg %p2695_p7 }
  0xa2   : > { %p2702_p12 = por %p2701_p10, %p2700_p3 }
  0xa4   : > { %p2703_p13 = pnand %p2702_p12, %p2696_p9 }
  0xa6   : > { %2706 = shalt.err (!%p2703_p13)
}
  0xa7   : > { %s2707_s26 = scalar_lea.vmem %s3093_s9, 128  ;;  %s2813_s25 = smov [#allocation2]  }
  0xa8   : > { %p2708_p5 = scmp.ne.s32.totalorder %s3093_s9, %s2707_s26  ;;  %s2712_s22 = sshll.u32 %s2813_s25, 4  ;;  %s2713_s22 = int_to_ptr.vmem [resolvable:$false] %s2712_s22 }
  0xa9   : > { %s2714_s11 = scalar_lea.vmem %s2713_s22, 256  ;;  %p2715_p6 = scmp.lt.s32.totalorder %s3093_s9, %s2713_s22 }
  0xaa   : > { %p2710_p7 = pnand %p2708_p5, %p2694_p8  ;;  %p2716_p4 = scmp.lt.s32.totalorder %s2714_s11, %s2707_s26 }
  0xac   : > { %p2711_p0 = pneg %p2710_p7  ;;  %p2717_p1 = por %p2716_p4, %p2715_p6 }
  0xae   : > { %p2718_p3 = pnand %p2717_p1, %p2711_p0 }
  0xb0   : > { %2721 = shalt.err (!%p2718_p3)
}
  0xb1   : > { %2382 = dma.hbm_to_vmem [thread:$0]  (!%p3089_p2), %s3087_s14, 128, %s3093_s9, %s464_s1  }
  0xb2   : > { %p3418_p9 = scmp.ne.s32.totalorder %s3406_s20, 0 }
  0xb3   : > { %s3123_s13 = sand.u32 (!%p3418_p9), 1, %s2792_s30  }
  0xb4   : > { %483 = sbr.rel (%p3418_p9) target bundleno = 3972 (0xf84), region = 76  ;;  %s2075_s17 = sshll.u32 (!%p3418_p9), %s3123_s13, 3 }
  0xb5   : > { %s486_s6 = scalar_lea.sflag (!%p3418_p9), [#allocation3], %s3123_s13  ;;  %s489_s26 = scalar_lea.vmem (!%p3418_p9), [#allocation2], %s2075_s17 }
  0xbb   : > { %2767 = dma.done.wait (%p3069_p11), %s486_s6, 128  }
  0xbc   : > { %2769 = vsyncadd (%p3069_p11), %s486_s6, 4294967168  ;;  %p3419_p6 = scmp.eq.s32.totalorder %s2917_s19, 0 }
  0xbe   : > { %2771 = dma.done.wait (%p3419_p6), [#allocation6], 3200   ;;  %p3420_p0 = pmov %p3419_p6 }
  0xc0   : > { %2773 = vsyncadd (%p3420_p0), [#allocation6], 4294964096  ;;  %p3421_p2 = pmov %p3420_p0 }
  0xc1   : > { %p3422_p8 = pmov %p3420_p0 }
  0xc2   : > { %2775 = dma.done.wait (%p3421_p2), [#allocation9], 3072  }
  0xc3   : > { %2777 = vsyncadd (%p3422_p8), [#allocation9], 4294964224  ;;  %p3423_p10 = pmov %p3420_p0 }
  0xc4   : > { %p3424_p12 = pmov %p3420_p0 }
  0xc5   : > { %2779 = dma.done.wait (%p3423_p10), [#allocation12], 2048  }
  0xc6   : > { %2781 = vsyncadd (%p3424_p12), [#allocation12], 4294965248  ;;  %v3145_v0 = vld [vmem:[%s489_s26] sm:$0xff]  ;;  %v2814_v3 = vmov 0.0   ;;  %v2454_v6 = vld [vmem:[#allocation7 + $0x18] ss:$12 sps:$4 sm:$0xff]   ;;  %v619_v41 = vlaneseq }
  0xc7   : > { %558 = vadd.xlane.f32.xlu0 %v3145_v0  ;;  %v2448_v1 = vld [vmem:[#allocation7 + $0x4] ss:$12 sps:$4 sm:$0xff]   ;;  %v2450_v2 = vld [vmem:[#allocation7] ss:$12 sps:$4 sm:$0xff]   ;;  %2231 = vmatprep.subr.bf16.mxu1 %v2814_v3  ;;  %v2451_v4 = vld [vmem:[#allocation7 + $0x8] ss:$12 sps:$4 sm:$0xff]  }
  0xc8   : > { %v2452_v5 = vld [vmem:[#allocation7 + $0x1c] ss:$12 sps:$4 sm:$0xff]   ;;  %762 = vmatprep.subr.bf16.mxu0 %v2448_v1  ;;  %v2455_v7 = vld [vmem:[#allocation7 + $0x20] ss:$12 sps:$4 sm:$0xff]   ;;  %2232 = vmatpush3.bf16.msra.mxu1 %v2451_v4  ;;  %v2459_v14 = vld [vmem:[#allocation7 + $0x38] ss:$12 sps:$4 sm:$0xff]  }
  0xc9   : > { %v2456_v8 = vld [vmem:[#allocation7 + $0x34] ss:$12 sps:$4 sm:$0xff]   ;;  %763 = vmatpush1.bf16.msra.mxu0 %v2450_v2  ;;  %2233 = vmatprep.subr.bf16.mxu1 %v2814_v3  ;;  %v2458_v13 = vld [vmem:[#allocation7 + $0x30] ss:$12 sps:$4 sm:$0xff]   ;;  %v2460_v15 = vld [vmem:[#allocation7 + $0x4c] ss:$12 sps:$4 sm:$0xff]  }
  0xca   : > { %764 = vmatprep.subr.bf16.mxu0 %v2452_v5  ;;  %v2462_v16 = vld [vmem:[#allocation7 + $0x48] ss:$12 sps:$4 sm:$0xff]   ;;  %v2463_v17 = vld [vmem:[#allocation7 + $0x50] ss:$12 sps:$4 sm:$0xff]   ;;  %v2466_v19 = vld [vmem:[#allocation7 + $0x60] ss:$12 sps:$4 sm:$0xff]  }
  0xcb   : > { %v2464_v18 = vld [vmem:[#allocation7 + $0x64] ss:$12 sps:$4 sm:$0xff]   ;;  %v2467_v20 = vld [vmem:[#allocation7 + $0x68] ss:$12 sps:$4 sm:$0xff]   ;;  %v2471_v23 = vld [vmem:[#allocation7 + $0x80] ss:$12 sps:$4 sm:$0xff]  }
  0xcc   : > { %2234 = vmatpush3.bf16.msra.mxu1 %v2455_v7  ;;  %v2468_v21 = vld [vmem:[#allocation7 + $0x7c] ss:$12 sps:$4 sm:$0xff]   ;;  %v2470_v22 = vld [vmem:[#allocation7 + $0x78] ss:$12 sps:$4 sm:$0xff]   ;;  %v2472_v24 = vld [vmem:[#allocation7 + $0x94] ss:$12 sps:$4 sm:$0xff]  }
  0xcd   : > { %765 = vmatpush1.bf16.msra.mxu0 %v2454_v6  ;;  %2235 = vmatprep.subr.bf16.mxu1 %v2814_v3  ;;  %v2815_v25 = vmov 0   ;;  %vm2816_vm0 = vmmov 0   ;;  %v2474_v26 = vld [vmem:[#allocation7 + $0x90] ss:$12 sps:$4 sm:$0xff]   ;;  %v2475_v27 = vld [vmem:[#allocation7 + $0x98] ss:$12 sps:$4 sm:$0xff]  }
  0xce   : > { %766 = vmatprep.subr.bf16.mxu0 %v2456_v8  ;;  %794 = vmatprep.mubr.bf16.mxu0 %v2815_v25  ;;  %v2476_v28 = vld [vmem:[#allocation7 + $0xac] ss:$12 sps:$4 sm:$0xff]   ;;  %v2478_v29 = vld [vmem:[#allocation7 + $0xa8] ss:$12 sps:$4 sm:$0xff]   ;;  %v2479_v30 = vld [vmem:[#allocation7 + $0xb0] ss:$12 sps:$4 sm:$0xff]  }
  0xcf   : > { %2247 = vmatprep.mubr.msk.bf16.mxu1 %vm2816_vm0, %v2814_v3  ;;  %v2082_v35 = vld [vmem:[%s3381_s2] ss:$0 sm:$0xff]  ;;  %v3172_v42 = vshrl.u32 %v619_v41, 7  ;;  %vm946_vm1 = vcmask 1043456   ;;  %s2817_s25 = smov 96   ;;  %s2818_s22 = smov 64  }
  0xd0   : > { %2236 = vmatpush3.bf16.msra.mxu1 %v2459_v14  ;;  %v2083_v37 = vld [vmem:[%s3382_s3] ss:$0 sm:$0xff]  ;;  %vm886_vm2 = vcmask 261120   ;;  %vm930_vm3 = vcmask 64512   ;;  %s2819_s11 = smov 32   ;;  %s3425_s23 = sld [smem:[#allocation21_spill]] }
  0xd1   : > { %767 = vmatpush1.bf16.msra.mxu0 %v2458_v13  ;;  %2237 = vmatprep.subr.bf16.mxu1 %v2814_v3  ;;  %v621_v43 = vsub.s32 0, %v3172_v42  ;;  %v629_v44 = vsub.s32 2, %v3172_v42  ;;  %v617_v45 = vld [vmem:[%s3384_s5] sm:$0x7]  ;;  %v625_v61 = vsub.s32 1, %v3172_v42  ;;  %s3427_s26 = sld [smem:[#allocation23_spill]] }
  0xd2   : > { %768 = vmatprep.subr.bf16.mxu0 %v2460_v15  ;;  %s2165_s20 = sshll.u32 %s2917_s19, 7  ;;  %s553_s24 = scalar_lea.vmem [#allocation13], %s2075_s17 }
  0xd3   : > { %v622_v46 = vrot.slane %v617_v45, %v621_v43  ;;  %v630_v47 = vrot.slane %v617_v45, %v629_v44  ;;  %v626_v62 = vrot.slane %v617_v45, %v625_v61  ;;  %s1946_s14 = sshll.u32 %s553_s24, 4  ;;  %s3428_s1 = sld [smem:[#allocation24_spill]]  ;;  %s3337_s14 = int_to_ptr.vmem [resolvable:$true] %s1946_s14 }
  0xd4   : > { %2238 = vmatpush3.bf16.msra.mxu1 %v2463_v17  ;;  %p3429_p13 = scmp.ne.s32.totalorder %s3415_s27, 0  ;;  %s2820_s19 = smov [#allocation13]  }
  0xd5   : > { %769 = vmatpush1.bf16.msra.mxu0 %v2462_v16  ;;  %2239 = vmatprep.subr.bf16.mxu1 %v2814_v3  ;;  %s2726_s17 = sshll.u32 %s2820_s19, 4  ;;  %s2727_s17 = int_to_ptr.vmem [resolvable:$false] %s2726_s17 }
  0xd6   : > { %770 = vmatprep.subr.bf16.mxu0 %v2464_v18  ;;  %s2728_s6 = scalar_lea.vmem %s2727_s17, 256  ;;  %p2729_p4 = scmp.lt.s32.totalorder %s3337_s14, %s2727_s17 }
  0xd8   : > { %2240 = vmatpush3.bf16.msra.mxu1 %v2467_v20 }
  0xd9   : > { %771 = vmatpush1.bf16.msra.mxu0 %v2466_v19  ;;  %2241 = vmatprep.subr.bf16.mxu1 %v2814_v3 }
  0xda   : > { %772 = vmatprep.subr.bf16.mxu0 %v2468_v21 }
  0xdc   : > { %2242 = vmatpush3.bf16.msra.mxu1 %v2471_v23 }
  0xdd   : > { %773 = vmatpush1.bf16.msra.mxu0 %v2470_v22  ;;  %2243 = vmatprep.subr.bf16.mxu1 %v2814_v3 }
  0xde   : > { %774 = vmatprep.subr.bf16.mxu0 %v2472_v24 }
  0xe0   : > { %2244 = vmatpush3.bf16.msra.mxu1 %v2475_v27 }
  0xe1   : > { %775 = vmatpush1.bf16.msra.mxu0 %v2474_v26  ;;  %2245 = vmatprep.subr.bf16.mxu1 %v2814_v3  ;;  %v3226_v26 = vld [vmem:[#allocation5] sm:$0xff] }
  0xe2   : > { %776 = vmatprep.subr.bf16.mxu0 %v2476_v28 }
  0xe4   : > { %2246 = vmatpush3.bf16.msra.mxu1 %v2479_v30 }
  0xe5   : > { %777 = vmatpush1.bf16.msra.mxu0 %v2478_v29  ;;  %2259 = vmatprep.subr.bf16.mxu1 %v2814_v3 }
  0xe6   : > { %2251 = vmatprep.subr.bf16.mxu0 %v2814_v3 }
 0x154   : > { %v559_v9 = vpop.xlane.xlu0 %558 }
 0x155   : > { %v561_v10 = vmul.f32 0.0078125, %v559_v9 }
 0x157   : > { %v562_v11 = vsub.f32 %v3145_v0, %v561_v10 }
 0x159   : > { %v563_v12 = vmul.f32 %v562_v11, %v562_v11 }
 0x15b   : > { %564 = vadd.xlane.f32.xlu0 %v563_v12 }
 0x1e8   : > { %v565_v31 = vpop.xlane.xlu0 %564 }
 0x1e9   : > { %v566_v32 = vmul.f32 0.0078125, %v565_v31 }
 0x1eb   : > { %v567_v33 = vadd.f32 1e-05, %v566_v32 }
 0x1ed   : > { %2528 = vrsqrt.f32 %v567_v33 }
 0x1f7   : > { %v2529_v34 = vpop.eup %2528 }
 0x1f8   : > { %v569_v36 = vmul.f32 %v2529_v34, %v562_v11 }
 0x1fa   : > { %v576_v38 = vmul.f32 %v2082_v35, %v569_v36 }
 0x1fc   : > { %v583_v39 = vadd.f32 %v2083_v37, %v576_v38 }
 0x1fe   : > { %v584_v40 = vpack.c.bf16 %v583_v39, %v583_v39 }
 0x200   : > { %795 = vmatmul.mubr.bf16.vlgmr.msra.gmra.mrb[0].mxu0 %v584_v40  ;;  %2248 = vmatmul.mubr.bf16.vlgmr.msra.gmra.mrb[0].mxu1 %v584_v40 }
 0x201   : > { %2255 = vmatprep.mubr.msk.bf16.mxu0 %vm2816_vm0, %v2814_v3  ;;  %2261 = vmatprep.mubr.msk.bf16.mxu1 %vm2816_vm0, %v2814_v3 }
 0x2d3   : > { %v796_v48 = vpop.f32.mrb[0].mxu0  ;;  %v837_v49 = vpop.f32.mrb[0].mxu1 }
 0x2d4   : > { %v797_v50 = vadd.f32 %v796_v48, %v622_v46  ;;  %v838_v51 = vadd.f32 %v837_v49, %v630_v47  ;;  %v798_v52 = vpop.f32.mrb[1].mxu0  ;;  %v2249_v53 = vpop.f32.mrb[1].mxu1 }
 0x2d5   : > { %v800_v54 = vpop.f32.mrb[2].mxu0  ;;  %v840_v55 = vpop.f32.mrb[2].mxu1  ;;  %v799_v63 = vadd.f32 %v798_v52, %v626_v62 }
 0x2d6   : > { %v3181_v56 = vpack.c.bf16 %v797_v50, %v797_v50  ;;  %v3183_v57 = vpack.c.bf16 %v838_v51, %v838_v51  ;;  %v801_v58 = vpop.f32.mrb[3].mxu0  ;;  %v2250_v59 = vpop.f32.mrb[3].mxu1 }
 0x2d8   : > { %996 = vrot.lane.b32.xlu1 %v3181_v56, %s2817_s25  ;;  %v948_v60 = vsel %vm946_vm1, %v3183_v57, 0 }
 0x2d9   : > { %2260 = vmatpush3.bf16.msra.mxu1 %v948_v60 }
 0x2da   : > { %2273 = vmatprep.subr.bf16.mxu1 %v2814_v3 }
 0x301   : > { %844 = vxpose.xlu1.b32.start.end [1/1] (short) %v799_v63, 128  ;;  %v2480_v63 = vld [vmem:[#allocation8] sm:$0xff]  }
 0x34a   : > { %v997_v1 = vpop.permute.xlu1 %996 }
 0x35b   : > { %1217 = vrot.lane.b32.xlu1 %v3181_v56, %s2818_s22 }
 0x381   : > { %v860_v2 = vpop.trf.xlu1 }
 0x385   : > { %v861_v4 = vpop.trf.xlu1 }
 0x386   : > { %v876_v5 = vpack.c.bf16 %v861_v4, %v860_v2  ;;  %v2481_v2 = vld [vmem:[#allocation8 + $0x8] sm:$0xff]   ;;  %v2482_v4 = vld [vmem:[#allocation8 + $0x10] sm:$0xff]  }
 0x388   : > { %2252 = vmatpush3.bf16.msra.mxu0 %v876_v5  ;;  %v2483_v5 = vld [vmem:[#allocation8 + $0x18] sm:$0xff]  }
 0x389   : > { %v862_v6 = vpop.trf.xlu1  ;;  %2253 = vmatprep.subr.bf16.mxu0 %v2814_v3 }
 0x38d   : > { %v863_v7 = vpop.trf.xlu1 }
 0x38e   : > { %v877_v8 = vpack.c.bf16 %v863_v7, %v862_v6 }
 0x390   : > { %2254 = vmatpush3.bf16.msra.mxu0 %v877_v8 }
 0x391   : > { %v864_v9 = vpop.trf.xlu1  ;;  %2265 = vmatprep.subr.bf16.mxu0 %v2814_v3 }
 0x393   : > { %2256 = vmatmul.mubr.msk.bf16.vlgmr.msra.gmra.mrb[4].mxu0 %vm886_vm2, %v3181_v56 }
 0x394   : > { %2269 = vmatprep.mubr.msk.bf16.mxu0 %vm2816_vm0, %v2814_v3 }
 0x395   : > { %v865_v10 = vpop.trf.xlu1 }
 0x396   : > { %v878_v11 = vpack.c.bf16 %v865_v10, %v864_v9 }
 0x398   : > { %2266 = vmatpush3.bf16.msra.mxu0 %v878_v11 }
 0x399   : > { %v866_v12 = vpop.trf.xlu1  ;;  %2267 = vmatprep.subr.bf16.mxu0 %v2814_v3 }
 0x39d   : > { %v867_v13 = vpop.trf.xlu1 }
 0x39e   : > { %v879_v14 = vpack.c.bf16 %v867_v13, %v866_v12 }
 0x3a0   : > { %2268 = vmatpush3.bf16.msra.mxu0 %v879_v14 }
 0x3a1   : > { %v3202_v15 = vpop.trf.xlu1  ;;  %2279 = vmatprep.subr.bf16.mxu0 %v2814_v3 }
 0x3a3   : > { %2270 = vmatmul.mubr.msk.bf16.vlgmr.msra.gmra.mrb[8].mxu0 %vm886_vm2, %v997_v1 }
 0x3a4   : > { %2283 = vmatprep.mubr.msk.bf16.mxu0 %vm2816_vm0, %v2814_v3  ;;  %2280 = vmatpush3.bf16.msra.mxu0 %v2482_v4 }
 0x3a5   : > { %v3208_v16 = vpop.trf.xlu1  ;;  %2281 = vmatprep.subr.bf16.mxu0 %v2814_v3 }
 0x3a6   : > { %v880_v14 = vpack.c.bf16 %v3208_v16, %v3202_v15 }
 0x3a8   : > { %2282 = vmatpush3.bf16.msra.mxu0 %v2483_v5 }
 0x3a9   : > { %v3210_v17 = vpop.trf.xlu1  ;;  %2295 = vmatprep.subr.bf16.mxu0 %v2814_v3 }
 0x3ad   : > { %v3212_v18 = vpop.trf.xlu1 }
 0x3b1   : > { %v3214_v19 = vpop.trf.xlu1 }
 0x3b5   : > { %v3216_v20 = vpop.trf.xlu1 }
 0x3b6   : > { %v882_v21 = vpack.c.bf16 %v3216_v20, %v3214_v19 }
 0x3b9   : > { %v3220_v22 = vpop.trf.xlu1 }
 0x3bd   : > { %v3222_v23 = vpop.trf.xlu1 }
 0x3be   : > { %v883_v24 = vpack.c.bf16 %v3222_v23, %v3220_v22 }
 0x466   : > { %v924_v27 = vpop.f32.mrb[4].mxu0 }
 0x467   : > { %v925_v28 = vadd.f32 %v924_v27, %v3226_v26  ;;  %v2257_v29 = vpop.f32.mrb[5].mxu0 }
 0x468   : > { %v927_v30 = vpop.f32.mrb[6].mxu0  ;;  %v881_v29 = vpack.c.bf16 %v3212_v18, %v3210_v17 }
 0x469   : > { %v2258_v31 = vpop.f32.mrb[7].mxu0  ;;  %v931_v32 = vsel %vm930_vm3, %v925_v28, -inf  ;;  %v1218_v30 = vpop.permute.xlu1 %1217 }
 0x46a   : > { %932 = vmax.xlane.f32.xlu0 %v931_v32 }
 0x476   : > { %v1035_v33 = vpop.f32.mrb[8].mxu0 }
 0x477   : > { %v1036_v34 = vadd.f32 %v1035_v33, %v3226_v26  ;;  %v2271_v35 = vpop.f32.mrb[9].mxu0 }
 0x478   : > { %v1038_v36 = vpop.f32.mrb[10].mxu0 }
 0x479   : > { %v2272_v37 = vpop.f32.mrb[11].mxu0  ;;  %v1041_v38 = vsel %vm930_vm3, %v1036_v34, -inf }
 0x47a   : > { %1042 = vmax.xlane.f32.xlu0 %v1041_v38 }
 0x4f7   : > { %v933_v39 = vpop.xlane.xlu0 %932 }
 0x4f8   : > { %v934_v40 = vsub.f32 %v925_v28, %v933_v39 }
 0x4fa   : > { %v935_v41 = vmul.f32 1.442695, %v934_v40 }
 0x4fc   : > { %2530 = vpow2.f32 %v935_v41 }
 0x506   : > { %v2531_v44 = vpop.eup %2530 }
 0x507   : > { %v1043_v45 = vpop.xlane.xlu0 %1042  ;;  %v937_v46 = vsel %vm930_vm3, %v2531_v44, 0.0 }
 0x508   : > { %v1044_v47 = vsub.f32 %v1036_v34, %v1043_v45  ;;  %938 = vadd.xlane.f32.xlu0 %v937_v46 }
 0x50a   : > { %v1045_v48 = vmul.f32 1.442695, %v1044_v47 }
 0x50c   : > { %2532 = vpow2.f32 %v1045_v48 }
 0x516   : > { %v2533_v49 = vpop.eup %2532 }
 0x517   : > { %v1047_v50 = vsel %vm930_vm3, %v2533_v49, 0.0 }
 0x518   : > { %1048 = vadd.xlane.f32.xlu0 %v1047_v50 }
 0x52e   : > { %1054 = vrot.lane.b32.xlu0 %v3183_v57, %s2817_s25  ;;  %s3335_s25 = scalar_lea.hbm %s3428_s1, %s2165_s20 }
 0x595   : > { %v939_v51 = vpop.xlane.xlu0 %938 }
 0x596   : > { %2534 = vrcp.f32 %v939_v51 }
 0x5a0   : > { %v2535_v52 = vpop.eup %2534 }
 0x5a1   : > { %v941_v53 = vmul.f32 %v2535_v52, %v2531_v44 }
 0x5a3   : > { %v942_v54 = vpack.c.bf16 %v941_v53, %v941_v53 }
 0x5a5   : > { %2262 = vmatmul.mubr.msk.bf16.vlgmr.msra.gmra.mrb[4].mxu1 %vm930_vm3, %v942_v54  ;;  %v1049_v55 = vpop.xlane.xlu0 %1048 }
 0x5a6   : > { %2536 = vrcp.f32 %v1049_v55  ;;  %2275 = vmatprep.mubr.msk.bf16.mxu1 %vm2816_vm0, %v2814_v3 }
 0x5a9   : > { %v1055_v58 = vpop.permute.xlu0 %1054 }
 0x5aa   : > { %v1060_v59 = vsel %vm946_vm1, %v1055_v58, 0  ;;  %v2485_v58 = vld [vmem:[#allocation8 + $0x28] sm:$0xff]  }
 0x5ab   : > { %2274 = vmatpush3.bf16.msra.mxu1 %v1060_v59 }
 0x5ac   : > { %2287 = vmatprep.subr.bf16.mxu1 %v2814_v3 }
 0x5b0   : > { %v2537_v60 = vpop.eup %2536 }
 0x5b1   : > { %v1051_v62 = vmul.f32 %v2537_v60, %v2533_v49  ;;  %v2484_v49 = vld [vmem:[#allocation8 + $0x20] sm:$0xff]  }
 0x5b3   : > { %v1052_v1 = vpack.c.bf16 %v1051_v62, %v1051_v62 }
 0x5b5   : > { %2276 = vmatmul.mubr.msk.bf16.vlgmr.msra.gmra.mrb[8].mxu1 %vm930_vm3, %v1052_v1 }
 0x5b6   : > { %2288 = vmatpush3.bf16.msra.mxu1 %v2480_v63  ;;  %2291 = vmatprep.mubr.msk.bf16.mxu1 %vm2816_vm0, %v2814_v3 }
 0x5b7   : > { %2289 = vmatprep.subr.bf16.mxu1 %v2814_v3 }
 0x5ba   : > { %2290 = vmatpush3.bf16.msra.mxu1 %v2481_v2 }
 0x5bb   : > { %2303 = vmatprep.subr.bf16.mxu1 %v2814_v3 }
 0x678   : > { %v984_v6 = vpop.f32.mrb[4].mxu1 }
 0x679   : > { %v990_v7 = vpack.c.bf16 %v984_v6, %v984_v6  ;;  %v2263_v8 = vpop.f32.mrb[5].mxu1 }
 0x67a   : > { %v987_v9 = vpop.f32.mrb[6].mxu1 }
 0x67b   : > { %v2264_v10 = vpop.f32.mrb[7].mxu1  ;;  %2292 = vmatmul.mubr.msk.bf16.vlgmr.msra.gmra.mrb[12].mxu1 %vm886_vm2, %v990_v7  ;;  %v2486_v9 = vld [vmem:[#allocation8 + $0x30] sm:$0xff]  }
 0x67c   : > { %2305 = vmatprep.mubr.msk.bf16.mxu1 %vm2816_vm0, %v2814_v3 }
 0x688   : > { %v1096_v11 = vpop.f32.mrb[8].mxu1 }
 0x689   : > { %v1102_v12 = vpack.c.bf16 %v1096_v11, %v1096_v11  ;;  %v2277_v13 = vpop.f32.mrb[9].mxu1 }
 0x68a   : > { %v1099_v27 = vpop.f32.mrb[10].mxu1 }
 0x68b   : > { %v2278_v28 = vpop.f32.mrb[11].mxu1  ;;  %2284 = vmatmul.mubr.msk.bf16.vlgmr.msra.gmra.mrb[12].mxu0 %vm886_vm2, %v1102_v12 }
 0x68c   : > { %2296 = vmatpush3.bf16.msra.mxu0 %v880_v14  ;;  %2299 = vmatprep.mubr.msk.bf16.mxu0 %vm2816_vm0, %v2814_v3 }
 0x68d   : > { %2297 = vmatprep.subr.bf16.mxu0 %v2814_v3 }
 0x690   : > { %2298 = vmatpush3.bf16.msra.mxu0 %v881_v29 }
 0x691   : > { %2309 = vmatprep.subr.bf16.mxu0 %v2814_v3 }
 0x693   : > { %2300 = vmatmul.mubr.msk.bf16.vlgmr.msra.gmra.mrb[16].mxu0 %vm886_vm2, %v1218_v30  ;;  %v2487_v30 = vld [vmem:[#allocation8 + $0x38] sm:$0xff]  }
 0x694   : > { %2313 = vmatprep.mubr.msk.bf16.mxu0 %vm2816_vm0, %v2814_v3  ;;  %2310 = vmatpush3.bf16.msra.mxu0 %v2484_v49  ;;  %v2499_v49 = vld [vmem:[#allocation10 + $0x34] ss:$8 sps:$4 sm:$0xff]  }
 0x695   : > { %2311 = vmatprep.subr.bf16.mxu0 %v2814_v3 }
 0x698   : > { %2312 = vmatpush3.bf16.msra.mxu0 %v2485_v58  ;;  %v2511_v58 = vld [vmem:[#allocation10 + $0x74] ss:$8 sps:$4 sm:$0xff]  }
 0x699   : > { %2325 = vmatprep.subr.bf16.mxu0 %v2814_v3 }
 0x74e   : > { %v1211_v15 = vpop.f32.mrb[12].mxu1 }
 0x74f   : > { %v2293_v16 = vpop.f32.mrb[13].mxu1 }
 0x750   : > { %v1214_v31 = vpop.f32.mrb[14].mxu1 }
 0x751   : > { %v2294_v32 = vpop.f32.mrb[15].mxu1 }
 0x75e   : > { %v1156_v33 = vpop.f32.mrb[12].mxu0 }
 0x75f   : > { %v3263_v34 = vadd.f32 %v1211_v15, %v1156_v33  ;;  %v2285_v35 = vpop.f32.mrb[13].mxu0 }
 0x760   : > { %v1159_v36 = vpop.f32.mrb[14].mxu0 }
 0x761   : > { %v2286_v37 = vpop.f32.mrb[15].mxu0 }
 0x766   : > { %v1256_v17 = vpop.f32.mrb[16].mxu0 }
 0x767   : > { %v1257_v18 = vadd.f32 %v1256_v17, %v3226_v26  ;;  %v2301_v38 = vpop.f32.mrb[17].mxu0 }
 0x768   : > { %v1259_v39 = vpop.f32.mrb[18].mxu0  ;;  %v2488_v38 = vld [vmem:[#allocation10] ss:$8 sps:$4 sm:$0xff]  }
 0x769   : > { %v2302_v40 = vpop.f32.mrb[19].mxu0  ;;  %v1262_v41 = vsel %vm930_vm3, %v1257_v18, -inf  ;;  %v2490_v39 = vld [vmem:[#allocation10 + $0x4] ss:$8 sps:$4 sm:$0xff]  }
 0x76a   : > { %1263 = vmax.xlane.f32.xlu0 %v1262_v41  ;;  %v2493_v40 = vld [vmem:[#allocation10 + $0x14] ss:$8 sps:$4 sm:$0xff]   ;;  %v2491_v41 = vld [vmem:[#allocation10 + $0x10] ss:$8 sps:$4 sm:$0xff]  }
 0x7f7   : > { %v1264_v44 = vpop.xlane.xlu0 %1263 }
 0x7f8   : > { %v1265_v45 = vsub.f32 %v1257_v18, %v1264_v44  ;;  %v2496_v44 = vld [vmem:[#allocation10 + $0x24] ss:$8 sps:$4 sm:$0xff]  }
 0x7fa   : > { %v1266_v46 = vmul.f32 1.442695, %v1265_v45  ;;  %v2494_v45 = vld [vmem:[#allocation10 + $0x20] ss:$8 sps:$4 sm:$0xff]  }
 0x7fc   : > { %2538 = vpow2.f32 %v1266_v46 }
 0x806   : > { %v2539_v47 = vpop.eup %2538 }
 0x807   : > { %v1268_v48 = vsel %vm930_vm3, %v2539_v47, 0.0 }
 0x808   : > { %1269 = vadd.xlane.f32.xlu0 %v1268_v48 }
 0x81e   : > { %1274 = vrot.lane.b32.xlu0 %v3183_v57, %s2818_s22  ;;  %s3426_s22 = sld [smem:[#allocation22_spill]] }
 0x822   : > { %1383 = vrot.lane.b32.xlu0 %v3181_v56, %s2819_s11 }
 0x895   : > { %v1270_v50 = vpop.xlane.xlu0 %1269 }
 0x896   : > { %2540 = vrcp.f32 %v1270_v50  ;;  %v2497_v50 = vld [vmem:[#allocation10 + $0x30] ss:$8 sps:$4 sm:$0xff]  }
 0x899   : > { %v1275_v51 = vpop.permute.xlu0 %1274 }
 0x89a   : > { %v1280_v52 = vsel %vm946_vm1, %v1275_v51, 0  ;;  %v2502_v51 = vld [vmem:[#allocation10 + $0x44] ss:$8 sps:$4 sm:$0xff]  }
 0x89b   : > { %2304 = vmatpush3.bf16.msra.mxu1 %v1280_v52  ;;  %v2500_v52 = vld [vmem:[#allocation10 + $0x40] ss:$8 sps:$4 sm:$0xff]  }
 0x89c   : > { %2317 = vmatprep.subr.bf16.mxu1 %v2814_v3 }
 0x89d   : > { %v1384_v56 = vpop.permute.xlu0 %1383 }
 0x8a0   : > { %v2541_v53 = vpop.eup %2540 }
 0x8a1   : > { %v1272_v54 = vmul.f32 %v2541_v53, %v2539_v47  ;;  %v2505_v53 = vld [vmem:[#allocation10 + $0x54] ss:$8 sps:$4 sm:$0xff]  }
 0x8a3   : > { %v1273_v55 = vpack.c.bf16 %v1272_v54, %v1272_v54  ;;  %v2503_v54 = vld [vmem:[#allocation10 + $0x50] ss:$8 sps:$4 sm:$0xff]  }
 0x8a5   : > { %2306 = vmatmul.mubr.msk.bf16.vlgmr.msra.gmra.mrb[16].mxu1 %vm930_vm3, %v1273_v55  ;;  %v2508_v55 = vld [vmem:[#allocation10 + $0x64] ss:$8 sps:$4 sm:$0xff]  }
 0x8a6   : > { %2318 = vmatpush3.bf16.msra.mxu1 %v882_v21  ;;  %2321 = vmatprep.mubr.msk.bf16.mxu1 %vm2816_vm0, %v2814_v3 }
 0x8a7   : > { %2319 = vmatprep.subr.bf16.mxu1 %v2814_v3 }
 0x8aa   : > { %2320 = vmatpush3.bf16.msra.mxu1 %v883_v24 }
 0x8ab   : > { %2331 = vmatprep.subr.bf16.mxu1 %v2814_v3 }
 0x8ad   : > { %2322 = vmatmul.mubr.msk.bf16.vlgmr.msra.gmra.mrb[20].mxu1 %vm886_vm2, %v1384_v56  ;;  %v2506_v56 = vld [vmem:[#allocation10 + $0x60] ss:$8 sps:$4 sm:$0xff]  }
 0x8ae   : > { %2335 = vmatprep.mubr.msk.bf16.mxu1 %vm2816_vm0, %v2814_v3  ;;  %2332 = vmatpush3.bf16.msra.mxu1 %v2486_v9  ;;  %v2519_v9 = vld [vmem:[#allocation11 + $0x18] sm:$0xff]  }
 0x8af   : > { %2333 = vmatprep.subr.bf16.mxu1 %v2814_v3 }
 0x8b2   : > { %2334 = vmatpush3.bf16.msra.mxu1 %v2487_v30 }
 0x978   : > { %v1316_v19 = vpop.f32.mrb[16].mxu1 }
 0x979   : > { %v1322_v20 = vpack.c.bf16 %v1316_v19, %v1316_v19  ;;  %v2307_v21 = vpop.f32.mrb[17].mxu1  ;;  %v2509_v19 = vld [vmem:[#allocation10 + $0x70] ss:$8 sps:$4 sm:$0xff]  }
 0x97a   : > { %v1319_v59 = vpop.f32.mrb[18].mxu1 }
 0x97b   : > { %v2308_v60 = vpop.f32.mrb[19].mxu1  ;;  %2314 = vmatmul.mubr.msk.bf16.vlgmr.msra.gmra.mrb[20].mxu0 %vm886_vm2, %v1322_v20 }
 0x97c   : > { %2327 = vmatprep.mubr.msk.bf16.mxu0 %vm2816_vm0, %v2814_v3 }
 0x980   : > { %v1422_v22 = vpop.f32.mrb[20].mxu1 }
 0x981   : > { %v1423_v23 = vadd.f32 %v1422_v22, %v3226_v26  ;;  %v2323_v24 = vpop.f32.mrb[21].mxu1  ;;  %v2129_v22 = vld [vmem:[%s3387_s8] ss:$0 sm:$0xff] }
 0x982   : > { %v1425_v62 = vpop.f32.mrb[22].mxu1  ;;  %v2130_v24 = vld [vmem:[%s3425_s23] ss:$0 sm:$0xff] }
 0x983   : > { %v2324_v63 = vpop.f32.mrb[23].mxu1  ;;  %v1428_v1 = vsel %vm930_vm3, %v1423_v23, -inf }
 0x984   : > { %1429 = vmax.xlane.f32.xlu0 %v1428_v1 }
 0x99a   : > { %1440 = vrot.lane.b32.xlu0 %v3183_v57, %s2819_s11  ;;  %s2722_s11 = scalar_lea.vmem %s3337_s14, 128 }
 0x99b   : > { %p2723_p11 = scmp.ne.s32.totalorder %s3337_s14, %s2722_s11  ;;  %p2730_p1 = scmp.lt.s32.totalorder %s2728_s6, %s2722_s11 }
 0x99d   : > { %p2724_p5 = pnand %p2723_p11, %p3429_p13  ;;  %p2731_p3 = por %p2730_p1, %p2729_p4 }
 0x99f   : > { %p2725_p7 = pneg %p2724_p5 }
 0x9a1   : > { %p2732_p9 = pnand %p2731_p3, %p2725_p7 }
 0xa11   : > { %v1430_v2 = vpop.xlane.xlu0 %1429 }
 0xa12   : > { %v1431_v4 = vsub.f32 %v1423_v23, %v1430_v2  ;;  %v2512_v2 = vld [vmem:[#allocation11 + $0x40] sm:$0xff]  }
 0xa13   : > { %2209 = vmatprep.subr.bf16.mxu1 %v2512_v2 }
 0xa14   : > { %v1432_v5 = vmul.f32 1.442695, %v1431_v4  ;;  %v2513_v4 = vld [vmem:[#allocation11] sm:$0xff]  }
 0xa15   : > { %v1441_v6 = vpop.permute.xlu0 %1440 }
 0xa16   : > { %2542 = vpow2.f32 %v1432_v5  ;;  %v1446_v7 = vsel %vm946_vm1, %v1441_v6, 0  ;;  %v2514_v5 = vld [vmem:[#allocation11 + $0x48] sm:$0xff]  }
 0xa17   : > { %2326 = vmatpush3.bf16.msra.mxu0 %v1446_v7  ;;  %v2515_v6 = vld [vmem:[#allocation11 + $0x8] sm:$0xff]   ;;  %v2516_v7 = vld [vmem:[#allocation11 + $0x50] sm:$0xff]  }
 0xa18   : > { %1694 = vmatprep.subr.bf16.mxu0 %v2490_v39 }
 0xa20   : > { %v2543_v8 = vpop.eup %2542 }
 0xa21   : > { %v1434_v26 = vsel %vm930_vm3, %v2543_v8, 0.0 }
 0xa22   : > { %1435 = vadd.xlane.f32.xlu1 %v1434_v26  ;;  %v2518_v26 = vld [vmem:[#allocation11 + $0x58] sm:$0xff]  }
 0xa4e   : > { %v1376_v10 = vpop.f32.mrb[20].mxu0 }
 0xa4f   : > { %v1382_v11 = vadd.f32 %v1376_v10, %v3263_v34  ;;  %v2315_v57 = vpop.f32.mrb[21].mxu0  ;;  %v2128_v34 = vld [vmem:[%s3386_s7] ss:$0 sm:$0xff]  ;;  %v2520_v10 = vld [vmem:[#allocation11 + $0x60] sm:$0xff]  }
 0xa50   : > { %v1379_v12 = vpop.f32.mrb[22].mxu0  ;;  %v2522_v57 = vld [vmem:[#allocation11 + $0x68] sm:$0xff]  }
 0xa51   : > { %v2316_v13 = vpop.f32.mrb[23].mxu0  ;;  %v2523_v12 = vld [vmem:[#allocation11 + $0x28] sm:$0xff]  }
 0xa52   : > { %v2524_v13 = vld [vmem:[#allocation11 + $0x70] sm:$0xff]  }
 0xaaf   : > { %v1436_v14 = vpop.xlane.xlu1 %1435 }
 0xab0   : > { %2544 = vrcp.f32 %v1436_v14  ;;  %v2525_v14 = vld [vmem:[#allocation11 + $0x30] sm:$0xff]  }
 0xaba   : > { %v2545_v27 = vpop.eup %2544 }
 0xabb   : > { %v1438_v28 = vmul.f32 %v2545_v27, %v2543_v8  ;;  %v2517_v8 = vld [vmem:[#allocation11 + $0x10] sm:$0xff]   ;;  %v2526_v27 = vld [vmem:[#allocation11 + $0x78] sm:$0xff]  }
 0xabd   : > { %v1439_v29 = vpack.c.bf16 %v1438_v28, %v1438_v28  ;;  %v2527_v28 = vld [vmem:[#allocation11 + $0x38] sm:$0xff]  }
 0xabf   : > { %2328 = vmatmul.mubr.msk.bf16.vlgmr.msra.gmra.mrb[24].mxu0 %vm930_vm3, %v1439_v29  ;;  %v1602_v29 = vld [vmem:[%s3426_s22] sm:$0x3]  ;;  %s1933_s22 = scalar_lea.sflag [#allocation4], %s3123_s13 }
 0xac0   : > { %1726 = vmatprep.mubr.bf16.mxu0 %v2815_v25  ;;  %1695 = vmatpush1.bf16.msra.mxu0 %v2488_v38  ;;  %v1607_v30 = vrot.slane %v1602_v29, %v621_v43 }
 0xac1   : > { %1696 = vmatprep.subr.bf16.mxu0 %v2493_v40 }
 0xac4   : > { %1697 = vmatpush1.bf16.msra.mxu0 %v2491_v41 }
 0xac5   : > { %1698 = vmatprep.subr.bf16.mxu0 %v2496_v44 }
 0xac8   : > { %1699 = vmatpush1.bf16.msra.mxu0 %v2494_v45 }
 0xac9   : > { %1700 = vmatprep.subr.bf16.mxu0 %v2499_v49 }
 0xacc   : > { %1701 = vmatpush1.bf16.msra.mxu0 %v2497_v50 }
 0xacd   : > { %1702 = vmatprep.subr.bf16.mxu0 %v2502_v51 }
 0xad0   : > { %1703 = vmatpush1.bf16.msra.mxu0 %v2500_v52  ;;  %v2147_v52 = vld [vmem:[%s3427_s26] ss:$0 sm:$0xff] }
 0xad1   : > { %1704 = vmatprep.subr.bf16.mxu0 %v2505_v53 }
 0xad4   : > { %1705 = vmatpush1.bf16.msra.mxu0 %v2503_v54 }
 0xad5   : > { %1706 = vmatprep.subr.bf16.mxu0 %v2508_v55 }
 0xad8   : > { %1707 = vmatpush1.bf16.msra.mxu0 %v2506_v56 }
 0xad9   : > { %1708 = vmatprep.subr.bf16.mxu0 %v2511_v58 }
 0xadc   : > { %1709 = vmatpush1.bf16.msra.mxu0 %v2509_v19 }
 0xb92   : > { %v1482_v15 = vpop.f32.mrb[24].mxu0 }
 0xb93   : > { %v1488_v16 = vpack.c.bf16 %v1482_v15, %v1482_v15  ;;  %v2329_v3 = vpop.f32.mrb[25].mxu0  ;;  %v1611_v15 = vrot.slane %v1602_v29, %v625_v61 }
 0xb94   : > { %v1485_v31 = vpop.f32.mrb[26].mxu0 }
 0xb95   : > { %v2330_v32 = vpop.f32.mrb[27].mxu0  ;;  %2336 = vmatmul.mubr.msk.bf16.vlgmr.msra.gmra.mrb[24].mxu1 %vm886_vm2, %v1488_v16 }
 0xb96   : > { %2210 = vmatpush3.bf16.msra.mxu1 %v2513_v4 }
 0xb97   : > { %2211 = vmatprep.subr.bf16.mxu1 %v2514_v5 }
 0xb9a   : > { %2212 = vmatpush3.bf16.msra.mxu1 %v2515_v6 }
 0xb9b   : > { %2213 = vmatprep.subr.bf16.mxu1 %v2516_v7 }
 0xb9e   : > { %2214 = vmatpush3.bf16.msra.mxu1 %v2517_v8 }
 0xb9f   : > { %2215 = vmatprep.subr.bf16.mxu1 %v2518_v26 }
 0xba2   : > { %2216 = vmatpush3.bf16.msra.mxu1 %v2519_v9 }
 0xba3   : > { %2217 = vmatprep.subr.bf16.mxu1 %v2520_v10 }
 0xc68   : > { %v1542_v33 = vpop.f32.mrb[24].mxu1 }
 0xc69   : > { %v1548_v35 = vadd.f32 %v1542_v33, %v1382_v11  ;;  %v2337_v36 = vpop.f32.mrb[25].mxu1  ;;  %v2521_v11 = vld [vmem:[#allocation11 + $0x20] sm:$0xff]  }
 0xc6a   : > { %v1545_v37 = vpop.f32.mrb[26].mxu1  ;;  %2218 = vmatpush3.bf16.msra.mxu1 %v2521_v11 }
 0xc6b   : > { %v1556_v17 = vadd.f32 %v2128_v34, %v1548_v35  ;;  %v2338_v18 = vpop.f32.mrb[27].mxu1  ;;  %2219 = vmatprep.subr.bf16.mxu1 %v2522_v57 }
 0xc6d   : > { %v3308_v25 = vadd.f32 %v1556_v17, %v3145_v0 }
 0xc6e   : > { %2220 = vmatpush3.bf16.msra.mxu1 %v2523_v12 }
 0xc6f   : > { %1560 = vadd.xlane.f32.xlu0 %v3308_v25  ;;  %2221 = vmatprep.subr.bf16.mxu1 %v2524_v13 }
 0xc72   : > { %2222 = vmatpush3.bf16.msra.mxu1 %v2525_v14 }
 0xc73   : > { %2223 = vmatprep.subr.bf16.mxu1 %v2526_v27 }
 0xc76   : > { %2224 = vmatpush3.bf16.msra.mxu1 %v2527_v28 }
 0xcfc   : > { %v1561_v46 = vpop.xlane.xlu0 %1560 }
 0xcfd   : > { %v1562_v47 = vmul.f32 0.0078125, %v1561_v46 }
 0xcff   : > { %v1563_v48 = vsub.f32 %v3308_v25, %v1562_v47 }
 0xd01   : > { %v1564_v0 = vmul.f32 %v1563_v48, %v1563_v48 }
 0xd03   : > { %1565 = vadd.xlane.f32.xlu1 %v1564_v0 }
 0xd90   : > { %v1566_v20 = vpop.xlane.xlu1 %1565 }
 0xd91   : > { %v1567_v21 = vmul.f32 0.0078125, %v1566_v20 }
 0xd93   : > { %v1568_v59 = vadd.f32 1e-05, %v1567_v21 }
 0xd95   : > { %2546 = vrsqrt.f32 %v1568_v59 }
 0xd9f   : > { %v2547_v60 = vpop.eup %2546 }
 0xda0   : > { %v1570_v23 = vmul.f32 %v2547_v60, %v1563_v48 }
 0xda2   : > { %v1577_v62 = vmul.f32 %v2129_v22, %v1570_v23 }
 0xda4   : > { %v1584_v63 = vadd.f32 %v2130_v24, %v1577_v62 }
 0xda6   : > { %v1585_v1 = vpack.c.bf16 %v1584_v63, %v1584_v63 }
 0xda8   : > { %1727 = vmatmul.mubr.bf16.vlgmr.msra.gmra.mrb[28].mxu0 %v1585_v1 }
 0xe7b   : > { %v1728_v16 = vpop.f32.mrb[28].mxu0 }
 0xe7c   : > { %v1729_v3 = vadd.f32 %v1728_v16, %v1607_v30  ;;  %v1730_v31 = vpop.f32.mrb[29].mxu0 }
 0xe7d   : > { %v1731_v32 = vadd.f32 %v1730_v31, %v1611_v15  ;;  %v1732_v33 = vpop.f32.mrb[30].mxu0 }
 0xe7e   : > { %v1737_v34 = vmul.f32 0.044715, %v1729_v3  ;;  %v1733_v35 = vpop.f32.mrb[31].mxu0  ;;  %v1735_v61 = vmul.f32 0.5, %v1729_v3 }
 0xe7f   : > { %v1738_v36 = vmul.f32 0.044715, %v1731_v32  ;;  %v1736_v46 = vmul.f32 0.5, %v1731_v32 }
 0xe80   : > { %v1739_v37 = vmul.f32 %v1737_v34, %v1729_v3 }
 0xe81   : > { %v1740_v17 = vmul.f32 %v1738_v36, %v1731_v32 }
 0xe82   : > { %v1741_v18 = vmul.f32 %v1739_v37, %v1729_v3 }
 0xe83   : > { %v1742_v38 = vmul.f32 %v1740_v17, %v1731_v32 }
 0xe84   : > { %v1743_v39 = vadd.f32 %v1741_v18, %v1729_v3 }
 0xe85   : > { %v1744_v40 = vadd.f32 %v1742_v38, %v1731_v32 }
 0xe86   : > { %v1745_v41 = vmul.f32 0.7978846, %v1743_v39 }
 0xe87   : > { %v1746_v44 = vmul.f32 0.7978846, %v1744_v40 }
 0xe88   : > { %2548 = vtanh.f32 %v1745_v41 }
 0xe89   : > { %2550 = vtanh.f32 %v1746_v44 }
 0xe92   : > { %v2549_v42 = vpop.eup %2548 }
 0xe93   : > { %v2551_v43 = vpop.eup %2550  ;;  %v1749_v45 = vadd.f32 1.0, %v2549_v42 }
 0xe94   : > { %v1750_v47 = vadd.f32 1.0, %v2551_v43 }
 0xe95   : > { %v1751_v48 = vmul.f32 %v1749_v45, %v1735_v61 }
 0xe96   : > { %v1752_v0 = vmul.f32 %v1750_v47, %v1736_v46 }
 0xe97   : > { %v1753_v50 = vpack.c.bf16 %v1751_v48, %v1751_v48 }
 0xe98   : > { %v1754_v49 = vpack.c.bf16 %v1752_v0, %v1752_v0 }
 0xe9a   : > { %1922 = vmatprep.mubr.bf16.mxu1 %v1754_v49 }
 0xe9b   : > { %1923 = vmatmul.mubr.bf16.vlgmr.msra.gmra.mrb[28].mxu1 %v1753_v50 }
 0xf6e   : > { %v2225_v51 = vpop.f32.mrb[28].mxu1 }
 0xf6f   : > { %v2226_v53 = vpop.f32.mrb[29].mxu1 }
 0xf70   : > { %v2227_v54 = vadd.f32 %v2226_v53, %v2225_v51  ;;  %v2228_v55 = vpop.f32.mrb[30].mxu1 }
 0xf71   : > { %v2229_v56 = vpop.f32.mrb[31].mxu1 }
 0xf72   : > { %v1925_v58 = vadd.f32 %v2227_v54, %v2147_v52 }
 0xf74   : > { %v1930_v19 = vadd.f32 %v1925_v58, %v3308_v25 }
 0xf76   : > { %1931 = vst [vmem:[%s553_s24] sm:$0xff] %v1930_v19 }
 0xf77   : > { %2735 = shalt.err (!%p2732_p9)
}
 0xf78   : > { %s2736_s13 = scalar_lea.hbm %s3335_s25, 128  ;;  %s2740_s24 = scalar_lea.hbm %s3428_s1, 256 }
 0xf79   : > { %p2737_p6 = scmp.ne.s32.totalorder %s3335_s25, %s2736_s13  ;;  %p2741_p8 = scmp.lt.u32.totalorder %s3335_s25, %s3428_s1 }
 0xf7a   : > { %p2742_p10 = scmp.lt.u32.totalorder %s2740_s24, %s2736_s13  ;;  %p2744_p11 = scmp.lt.u32.totalorder %s2736_s13, %s3335_s25 }
 0xf7b   : > { %p2738_p0 = pnand %p2737_p6, %p3429_p13 }
 0xf7c   : > { %p2743_p12 = por %p2742_p10, %p2741_p8 }
 0xf7d   : > { %p2739_p2 = pneg %p2738_p0 }
 0xf7e   : > { %p2745_p5 = por %p2744_p11, %p2743_p12 }
 0xf80   : > { %p2746_p7 = pnand %p2745_p5, %p2739_p2 }
 0xf82   : > { %2749 = shalt.err (!%p2746_p7)
}
 0xf83   : > { %2361 = dma.vmem_to_hbm [thread:$0]  (%p3429_p13), %s3337_s14, 128, %s3335_s25, %s1933_s22  }
 0xf84 PF: > { %s1958_s11 = sand.u32 1, %s2788_s29   ;;  %p3430_p4 = scmp.ne.s32.totalorder %s3416_s18, 0 }
 0xf85   : > { %p3431_p1 = scmp.ge.s32.totalorder %s2800_s16, 2  ;;  %s1959_s19 = scalar_lea.sflag [#allocation4], %s1958_s11 }
 0xf87   : > { %p2384_p3 = pnand %p3431_p1, %p3430_p4 }
 0xf89   : > { %2783 = dma.done.wait (!%p2384_p3), %s1959_s19, 128  }
 0xf8a   : > { %2785 = vsyncadd (!%p2384_p3), %s1959_s19, 4294967168  ;;  %p30_p9 = scmp.ge.s32.totalorder %s3053_s21, 4   ;;  %s3432_s29 = smov %s2792_s30 }
 0xf8b   : > { %s3433_s30 = smov %s2796_s15  ;;  %s3434_s15 = smov %s3065_s28 }
 0xf8c   : > { %s3435_s16 = smov %s3053_s21  ;;  %32 = sbr.rel (!%p30_p9) target bundleno = 15 (0xf), region = 141 }
 0xf93   :  { %1964 = vsyncpa [#allocation3], 1 }
 0xf94   :  { %1966 = vsyncpa [#allocation3 + $0x1], 1 }
 0xf95   :  { %1967 = vsyncpa [#allocation6], 1 }
 0xf96   :  { %1968 = vsyncpa [#allocation9], 1 }
 0xf97   :  { %1969 = vsyncpa [#allocation12], 1 }
 0xf98   :  { %1970 = vsyncpa [#allocation4], 1 }
 0xf99   :  { %1972 = vsyncpa [#allocation4 + $0x1], 1 }

</bundles_post_ra>
